<compile_context>
chip_gen: v5e
topology: v5e:2x2
jax: 0.10.0
libtpu: 0.0.40
codegen_flags: <defaults>
</compile_context>

<pallas_src>
import jax
import jax.numpy as jnp
from jax import lax
from jax.experimental import pallas as pl
from jax.experimental.pallas import tpu as pltpu


# --------------------------- fused CBOW kernel ------------------------------

def cbow_kernel(idx_ref, cb_ref, w_ref, out_ref, v_ref):
    """One grid step = one tile of output features.

    idx_ref: SMEM (4, B) int32   scalar-prefetched context-word indices
    cb_ref : VMEM (V, D) f32     embedding table (constant block, resident)
    w_ref  : VMEM (TN, D) f32    rows [j*TN, (j+1)*TN) of the UN-transposed Linear weight
    out_ref: VMEM (B, TN) f32    output tile
    v_ref  : VMEM (B, D) f32     scratch: summed embeddings, persists across steps
    """
    B = v_ref.shape[0]

    # Stage 1 (only on the first grid step): real gather + sum of the 4 lookups.
    @pl.when(pl.program_id(0) == 0)
    def _():
        def gather_row(b, carry):
            i0 = idx_ref[0, b]
            i1 = idx_ref[1, b]
            i2 = idx_ref[2, b]
            i3 = idx_ref[3, b]
            v_ref[pl.ds(b, 1), :] = (cb_ref[pl.ds(i0, 1), :]
                                     + cb_ref[pl.ds(i1, 1), :]
                                     + cb_ref[pl.ds(i2, 1), :]
                                     + cb_ref[pl.ds(i3, 1), :])
            return carry
        lax.fori_loop(0, B, gather_row, 0)

    # Stage 2: (B, D) x (TN, D)^T -> (B, TN), contracting the shared D axis.
    # Weight stays un-transposed; the MXU handles the transposed contraction.
    out_ref[...] = lax.dot_general(
        v_ref[...], w_ref[...],
        dimension_numbers=(((1,), (1,)), ((), ())),
        preferred_element_type=jnp.float32,
    ).astype(out_ref.dtype)


# ----------------------------- tiling helper --------------------------------

def _pick_tile_n(V, D, B, itemsize=4, vmem_budget_bytes=48 << 20):
    """Largest 128-multiple output-feature tile that divides V and keeps the
    resident codebook + v scratch + double-buffered weight/out tiles inside a
    budget sized for v7x's 64 MiB VMEM (also fits v5e/v6e)."""
    if V % 128 != 0:
        return V  # full-extent block is always legal
    resident = (2 * V * D + B * D) * itemsize              # codebook (2x buffered) + v scratch
    per_unit = (2 * 128 * D + 2 * B * 128) * itemsize      # dbl-buffered weight + out per 128 cols
    avail = max(vmem_budget_bytes - resident, per_unit)
    tile_n = min(V, int(avail // per_unit) * 128)
    tile_n = max(tile_n, 128)
    while V % tile_n != 0:                                  # keep an exact division of V
        tile_n -= 128
    return tile_n


# ------------------------------- wrapper -------------------------------------

def cbow_forward(x1, x2, x4, x5, codebook, weight):
    """codebook: (V, D) f32 (Embedding.weight);
    weight: (V, V) f32 (Linear.weight, PyTorch (out_features, in_features));
    x*: (B,) integer indices.  Returns (B, V) f32."""
    B = x1.shape[0]
    V, D = codebook.shape
    assert weight.shape == (V, V) and D == V, \
        "Linear(voc_num, voc_num) applied to embeddings requires voc_dim == voc_num"

    idx = jnp.stack([x1, x2, x4, x5], axis=0).astype(jnp.int32)
    idx = jnp.clip(idx, 0, V - 1)          # PyTorch would raise on OOB; we clip instead

    tile_n = _pick_tile_n(V, D, B)
    grid = (V // tile_n,)

    itemsize = 4
    vmem_needed = (2 * V * D + B * D + 2 * tile_n * D + 2 * B * tile_n) * itemsize
    vmem_limit = int(min(max(vmem_needed + (8 << 20), 16 << 20), 48 << 20))

    out = pl.pallas_call(
        cbow_kernel,
        out_shape=jax.ShapeDtypeStruct((B, V), jnp.float32),
        grid_spec=pltpu.PrefetchScalarGridSpec(
            num_scalar_prefetch=1,                              # idx -> SMEM
            grid=grid,
            in_specs=[
                pl.BlockSpec((V, D), lambda j, idx: (0, 0)),        # codebook: resident, reused
                pl.BlockSpec((tile_n, D), lambda j, idx: (j, 0)),   # weight rows: streamed
            ],
            out_specs=pl.BlockSpec((B, tile_n), lambda j, idx: (0, j)),
            scratch_shapes=[pltpu.VMEM((B, D), jnp.float32)],       # summed embeddings v
        ),
        compiler_params=pltpu.CompilerParams(
            # v is computed at step 0 and carried across steps -> axis must be sequential.
            dimension_semantics=("arbitrary",),
            vmem_limit_bytes=vmem_limit,
        ),
    )(idx, codebook, weight)
    return out


# --------------------------------- demo --------------------------------------

if __name__ == "__main__":
    # Linear(voc_num, voc_num) acting on the embedding output forces voc_dim == voc_num.
    VOC_NUM = 512   # vocabulary size V (multiple of 256: MXU-friendly on all generations)
    VOC_DIM = 512   # embedding dim D (== V)
    B = 128         # batch of context-word index tuples

    key = jax.random.PRNGKey(0)
    k_cb, k_w, k1, k2, k4, k5 = jax.random.split(key, 6)

    codebook = jax.random.normal(k_cb, (VOC_NUM, VOC_DIM), dtype=jnp.float32)        # Embedding.weight
    weight = (jax.random.uniform(k_w, (VOC_NUM, VOC_NUM), dtype=jnp.float32) - 0.5) \
             * (2.0 / jnp.sqrt(VOC_NUM))                                              # Linear.weight (out, in)

    x1 = jax.random.randint(k1, (B,), 0, VOC_NUM, dtype=jnp.int32)
    x2 = jax.random.randint(k2, (B,), 0, VOC_NUM, dtype=jnp.int32)
    x4 = jax.random.randint(k4, (B,), 0, VOC_NUM, dtype=jnp.int32)
    x5 = jax.random.randint(k5, (B,), 0, VOC_NUM, dtype=jnp.int32)

    out = cbow_forward(x1, x2, x4, x5, codebook, weight)
    out = jax.block_until_ready(out)

    # Pure-JAX reference (same math as the PyTorch forward).
    def ref(x):
        return codebook[x] @ weight.T
    expected = ref(x1) + ref(x2) + ref(x4) + ref(x5)

    assert out.shape == (B, VOC_NUM) and out.dtype == jnp.float32
    assert jnp.allclose(out, expected, atol=1e-3, rtol=1e-4), "mismatch vs reference"
    print("KERNEL_OK")
</pallas_src>

<mosaic_0001>
module attributes {stable_mosaic.version = 11 : i64} {
  func.func @cbow_kernel(%arg0: i32, %arg1: memref<4x128xi32, #tpu.memory_space<smem>>, %arg2: memref<512x512xf32, #tpu.memory_space<vmem>>, %arg3: memref<512x512xf32, #tpu.memory_space<vmem>>, %arg4: memref<128x512xf32, #tpu.memory_space<vmem>>, %arg5: memref<128x512xf32, #tpu.memory_space<vmem>>) attributes {dimension_semantics = [#tpu.dimension_semantics<arbitrary>], iteration_bounds = array<i64: 1>, scalar_prefetch = 1 : i64, scratch_operands = 1 : i64, tpu.core_type = #tpu.core_type<tc>, window_params = [{pipeline_mode = #tpu.pipeline_mode<synchronous>, transform_indices = @transform_0, window_bounds = array<i64: 512, 512>}, {transform_indices = @transform_1, window_bounds = array<i64: 512, 512>}, {transform_indices = @transform_2, window_bounds = array<i64: 128, 512>}]} {
    %c0_i32 = arith.constant 0 : i32
    %0 = arith.cmpi eq, %arg0, %c0_i32 : i32
    %1 = arith.extui %0 : i1 to i32
    %c0_i32_0 = arith.constant 0 : i32
    %2 = arith.cmpi ne, %1, %c0_i32_0 : i32
    scf.if %2 {
      %c0_i32_6 = arith.constant 0 : i32
      %c128_i32 = arith.constant 128 : i32
      %7 = arith.addi %c0_i32_6, %c128_i32 : i32
      %c1_i32 = arith.constant 1 : i32
      scf.for %arg6 = %c0_i32_6 to %7 step %c1_i32  : i32 {
        %c0_8 = arith.constant 0 : index
        %8 = arith.index_cast %arg6 : i32 to index
        %9 = memref.load %arg1[%c0_8, %8] : memref<4x128xi32, #tpu.memory_space<smem>>
        %c1 = arith.constant 1 : index
        %10 = arith.index_cast %arg6 : i32 to index
        %11 = memref.load %arg1[%c1, %10] : memref<4x128xi32, #tpu.memory_space<smem>>
        %c2 = arith.constant 2 : index
        %12 = arith.index_cast %arg6 : i32 to index
        %13 = memref.load %arg1[%c2, %12] : memref<4x128xi32, #tpu.memory_space<smem>>
        %c3 = arith.constant 3 : index
        %14 = arith.index_cast %arg6 : i32 to index
        %15 = memref.load %arg1[%c3, %14] : memref<4x128xi32, #tpu.memory_space<smem>>
        %16 = arith.index_cast %9 : i32 to index
        %c0_9 = arith.constant 0 : index
        %17 = vector.load %arg2[%16, %c0_9] : memref<512x512xf32, #tpu.memory_space<vmem>>, vector<1x512xf32>
        %18 = arith.index_cast %11 : i32 to index
        %c0_10 = arith.constant 0 : index
        %19 = vector.load %arg2[%18, %c0_10] : memref<512x512xf32, #tpu.memory_space<vmem>>, vector<1x512xf32>
        %20 = arith.addf %17, %19 : vector<1x512xf32>
        %21 = arith.index_cast %13 : i32 to index
        %c0_11 = arith.constant 0 : index
        %22 = vector.load %arg2[%21, %c0_11] : memref<512x512xf32, #tpu.memory_space<vmem>>, vector<1x512xf32>
        %23 = arith.addf %20, %22 : vector<1x512xf32>
        %24 = arith.index_cast %15 : i32 to index
        %c0_12 = arith.constant 0 : index
        %25 = vector.load %arg2[%24, %c0_12] : memref<512x512xf32, #tpu.memory_space<vmem>>, vector<1x512xf32>
        %26 = arith.addf %23, %25 : vector<1x512xf32>
        %27 = arith.index_cast %arg6 : i32 to index
        %c0_13 = arith.constant 0 : index
        %28 = vector.load %arg5[%27, %c0_13] : memref<128x512xf32, #tpu.memory_space<vmem>>, vector<1x512xf32>
        tpu.vector_store %arg5[%27, %c0_13], %26 {strides = array<i32>} : memref<128x512xf32, #tpu.memory_space<vmem>>, vector<1x512xf32>,
      }
      %c128_i32_7 = arith.constant 128 : i32
    } else {
    }
    %c0 = arith.constant 0 : index
    %c0_1 = arith.constant 0 : index
    %3 = vector.load %arg5[%c0, %c0_1] : memref<128x512xf32, #tpu.memory_space<vmem>>, vector<128x512xf32>
    %c0_2 = arith.constant 0 : index
    %c0_3 = arith.constant 0 : index
    %4 = vector.load %arg3[%c0_2, %c0_3] : memref<512x512xf32, #tpu.memory_space<vmem>>, vector<512x512xf32>
    %cst = arith.constant dense<0.000000e+00> : vector<128x512xf32>
    %5 = tpu.matmul %3, %4, %cst {dimension_numbers = #tpu.dot_dimension_numbers<[1], [1], [0], [0], [0, 0, 1, 0], [], []>} : vector<128x512xf32>, vector<512x512xf32>, vector<128x512xf32> -> vector<128x512xf32>
    %c0_4 = arith.constant 0 : index
    %c0_5 = arith.constant 0 : index
    %6 = vector.load %arg4[%c0_4, %c0_5] : memref<128x512xf32, #tpu.memory_space<vmem>>, vector<128x512xf32>
    tpu.vector_store %arg4[%c0_4, %c0_5], %5 {strides = array<i32>} : memref<128x512xf32, #tpu.memory_space<vmem>>, vector<128x512xf32>,
    return
  }
  func.func @transform_0(%arg0: i32, %arg1: memref<4x128xi32, #tpu.memory_space<smem>>) -> (i32, i32) {
    %c0_i32 = arith.constant 0 : i32
    %c0_i32_0 = arith.constant 0 : i32
    %c0_i32_1 = arith.constant 0 : i32
    return %c0_i32, %c0_i32_0 : i32, i32
  }
  func.func @transform_1(%arg0: i32, %arg1: memref<4x128xi32, #tpu.memory_space<smem>>) -> (i32, i32) {
    %c0_i32 = arith.constant 0 : i32
    %c0_i32_0 = arith.constant 0 : i32
    return %arg0, %c0_i32 : i32, i32
  }
  func.func @transform_2(%arg0: i32, %arg1: memref<4x128xi32, #tpu.memory_space<smem>>) -> (i32, i32) {
    %c0_i32 = arith.constant 0 : i32
    %c0_i32_0 = arith.constant 0 : i32
    return %c0_i32, %arg0 : i32, i32
  }
}

</mosaic_0001>

<bundles_post_ra>
// kernel: tpu_custom_call.1
= control target key start
LH: loop header
LB: loop body
LE: loop exit
PB: predicated region body
PF: predicated region fallthrough
CT: control target
= control target key end

     0   :  { %s1799_s15 = smov [#allocation4]   ;;  %s2375_s0 = inlined_call_operand.hbm [shape: s32[4,128], index: 0, kind: input, shape index: {}]   ;;  %s2376_s1 = inlined_call_operand.hbm [shape: f32[512,512], index: 1, kind: input, shape index: {}]   ;;  %s2377_s2 = inlined_call_operand.hbm [shape: f32[512,512], index: 2, kind: input, shape index: {}]   ;;  %s2378_s3 = inlined_call_operand.hbm [shape: f32[128,512], index: 3, kind: output, shape index: {}]  }
   0x1   :  { %s9_s14 = sshll.u32 %s2375_s0, 4  ;;  %s10_s14 = int_to_ptr.hbm [resolvable:$true] %s9_s14 }
   0x2   :  { %12 = dma.hbm_to_smem %s10_s14, 64, %s1799_s15, [#allocation3] }
   0x3   :  { %1787 = dma.done.wait [#allocation3], 64 }
   0x4   :  { %1788 = vsyncadd [#allocation3], 4294967232 }
   0x5   :  { %15 = sfence }
   0x6   :  { %16 = vsyncpa [#allocation6], 0 }
   0x7   :  { %17 = vsyncpa [#allocation9], 0 }
   0x8   :  { %18 = vsyncpa [#allocation7], 0  ;;  %s23_s18 = sshll.u32 %s2376_s1, 4  ;;  %s1800_s19 = smov [#allocation5]   ;;  %s24_s18 = int_to_ptr.hbm [resolvable:$true] %s23_s18 }
   0x9   :  { %s25_s20 = sshll.u32 %s1800_s19, 4  ;;  %s36_s0 = sshll.u32 %s2377_s2, 4  ;;  %s26_s20 = int_to_ptr.vmem [resolvable:$true] %s25_s20  ;;  %s37_s0 = int_to_ptr.hbm [resolvable:$true] %s36_s0 }
   0xa   :  { %s1801_s23 = smov 512   ;;  %s1802_s24 = smov 32  }
   0xb   :  { %31 = dma.hbm_to_vmem [thread:$0]  %s24_s18, 32768, %s26_s20, [#allocation6], %s1801_s23, %s1801_s23, %s1802_s24  }
   0xc   :  { %s1803_s25 = smov [#allocation8]  }
   0xd   :  { %s38_s26 = sshll.u32 %s1803_s25, 4  ;;  %s39_s26 = int_to_ptr.vmem [resolvable:$true] %s38_s26 }
   0xe   :  { %44 = dma.hbm_to_vmem [thread:$0]  %s37_s0, 32768, %s39_s26, [#allocation9], %s1801_s23, %s1801_s23, %s1802_s24  }
   0xf   :  { %1789 = dma.done.wait [#allocation6], 32768  }
  0x10   :  { %1790 = vsyncadd [#allocation6], 4294934528 }
  0x11   :  { %1791 = dma.done.wait [#allocation9], 32768  }
  0x12   :  { %1792 = vsyncadd [#allocation9], 4294934528  ;;  %s1840_s1 = smov 0  }
  0x13 LB: > { %s63_s2 = sld [smem:[#allocation4 + %s1797_s1]]  ;;  %s64_s27 = sshra.s32 %s1797_s1, 7  ;;  %v119_v3 = vlaneseq  ;;  %s1797_s1 = sphi %s1840_s1, %s62_s1  }
  0x14   : > { %s1610_s28 = sshll.u32 %s64_s27, 7  ;;  %s69_s29 = sand.u32 127, %s1797_s1 }
  0x15   : > { %s1611_s30 = sadd.s32 128, %s1610_s28  ;;  %s1613_s4 = sadd.s32 256, %s1610_s28  ;;  %vm121_vm0 = vcmp.lt.s32.totalorder %v119_v3, 512 }
  0x16   : > { %s70_s5 = sadd.s32 %s1611_s30, %s69_s29  ;;  %s74_s6 = sadd.s32 %s1613_s4, %s69_s29 }
  0x17   : > { %s71_s7 = sld [smem:[#allocation4 + %s70_s5]]  ;;  %s1615_s8 = sadd.s32 384, %s1610_s28 }
  0x18   : > { %s75_s9 = sld [smem:[#allocation4 + %s74_s6]]  ;;  %s78_s10 = sadd.s32 %s1615_s8, %s69_s29 }
  0x19   : > { %s1848_s11 = sld [smem:[#allocation4 + %s78_s10]]  ;;  %s80_s12 = sshra.s32 %s63_s2, 3 }
  0x1a   : > { %s83_s13 = sand.u32 7, %s63_s2  ;;  %s1616_s14 = sshll.u32 %s80_s12, 5 }
  0x1b   : > { %s86_s15 = sadd.s32 %s1616_s14, %s83_s13  ;;  %s123_s16 = sshra.s32 %s1797_s1, 3 }
  0x1c   : > { %s126_s17 = sand.u32 7, %s1797_s1  ;;  %s87_s22 = scalar_lea.vmem [#allocation5], %s86_s15 }
  0x1d   : > { %s89_s18 = sshra.s32 %s71_s7, 3  ;;  %s92_s19 = sand.u32 7, %s71_s7  ;;  %v88_v0 = vld [vmem:[%s87_s22] ss:$8 sm:$0xf] }
  0x1e   : > { %s1617_s20 = sshll.u32 %s89_s18, 5  ;;  %s99_s21 = sshra.s32 %s75_s9, 3 }
  0x1f   : > { %s95_s0 = sadd.s32 %s1617_s20, %s92_s19  ;;  %s102_s25 = sand.u32 7, %s75_s9 }
  0x20   : > { %s1618_s26 = sshll.u32 %s99_s21, 5  ;;  %s96_s27 = scalar_lea.vmem [#allocation5], %s95_s0 }
  0x21   : > { %v97_v1 = vld [vmem:[%s96_s27] ss:$8 sm:$0xf]  ;;  %s105_s28 = sadd.s32 %s1618_s26, %s102_s25  ;;  %s109_s29 = sshra.s32 %s1848_s11, 3 }
  0x22   : > { %v98_v2 = vadd.f32 %v97_v1, %v88_v0  ;;  %s112_s2 = sand.u32 7, %s1848_s11  ;;  %s106_s30 = scalar_lea.vmem [#allocation5], %s105_s28 }
  0x23   : > { %v107_v4 = vld [vmem:[%s106_s30] ss:$8 sm:$0xf]  ;;  %s1619_s4 = sshll.u32 %s109_s29, 5  ;;  %s1620_s5 = sshll.u32 %s123_s16, 5 }
  0x24   : > { %v108_v5 = vadd.f32 %v107_v4, %v98_v2  ;;  %s115_s6 = sadd.s32 %s1619_s4, %s112_s2  ;;  %s129_s7 = sadd.s32 %s1620_s5, %s126_s17 }
  0x25   : > { %s116_s8 = scalar_lea.vmem [#allocation5], %s115_s6  ;;  %s130_s9 = scalar_lea.vmem [#allocation2], %s129_s7 }
  0x26   : > { %v117_v6 = vld [vmem:[%s116_s8] ss:$8 sm:$0xf]  ;;  %s62_s1 = sadd.s32 1, %s1797_s1  }
  0x27   : > { %v118_v7 = vadd.f32 %v117_v6, %v108_v5  ;;  %p59_p0 = scmp.ge.s32.totalorder %s62_s1, 128  }
  0x28   :  { %v259_v8 = vld [vmem:[#allocation8 + $0x1f0] sm:$0xff] (%p59_p0)  ;;  %v260_v9 = vld [vmem:[#allocation8 + $0x1f8] sm:$0xff] (%p59_p0)  ;;  %v257_v10 = vld [vmem:[#allocation8 + $0x1e0] sm:$0xff] (%p59_p0)  ;;  %s1804_s1 = smov (%p59_p0), [#allocation10]   ;;  %s1563_s13 = sshll.u32 (%p59_p0), %s2378_s3, 4  ;;  %s1564_s13 = int_to_ptr.hbm [resolvable:$true] %s1563_s13 }
  0x29   : > { %131 = vst.msk [vmem:[%s130_s9] ss:$8 sm:$0xf] %vm121_vm0, %v118_v7  ;;  %61 = sbr.rel (!%p59_p0) target bundleno = 19 (0x13), region = 52  ;;  %583 = vmatpush.xpose.msra.mxu2 (%p59_p0), %v259_v8  ;;  %648 = vmatpush.xpose.msra.mxu3 (%p59_p0), %v260_v9  ;;  %v258_v11 = vld [vmem:[#allocation8 + $0x1e8] sm:$0xff] (%p59_p0)  ;;  %v255_v12 = vld [vmem:[#allocation8 + $0x1d0] sm:$0xff] (%p59_p0) }
  0x2a   :  { %453 = vmatpush.xpose.msra.mxu0 (%p59_p0), %v257_v10  ;;  %518 = vmatpush.xpose.msra.mxu1 (%p59_p0), %v258_v11  ;;  %v256_v13 = vld [vmem:[#allocation8 + $0x1d8] sm:$0xff] (%p59_p0)  ;;  %v253_v14 = vld [vmem:[#allocation8 + $0x1c0] sm:$0xff] (%p59_p0)  ;;  %v254_v15 = vld [vmem:[#allocation8 + $0x1c8] sm:$0xff] (%p59_p0)  ;;  %s1561_s10 = sshll.u32 (%p59_p0), %s1804_s1, 4  ;;  %s1562_s10 = int_to_ptr.vmem [resolvable:$true] %s1561_s10 }
  0x2b   :  { %v251_v16 = vld [vmem:[#allocation8 + $0x1b0] sm:$0xff] (%p59_p0)  ;;  %v252_v17 = vld [vmem:[#allocation8 + $0x1b8] sm:$0xff] (%p59_p0)  ;;  %v249_v18 = vld [vmem:[#allocation8 + $0x1a0] sm:$0xff] (%p59_p0) }
  0x2c   :  { %v250_v19 = vld [vmem:[#allocation8 + $0x1a8] sm:$0xff] (%p59_p0)  ;;  %v247_v20 = vld [vmem:[#allocation8 + $0x190] sm:$0xff] (%p59_p0)  ;;  %v248_v21 = vld [vmem:[#allocation8 + $0x198] sm:$0xff] (%p59_p0) }
  0x2d   :  { %584 = vmatpush.xpose.msra.mxu2 (%p59_p0), %v255_v12  ;;  %649 = vmatpush.xpose.msra.mxu3 (%p59_p0), %v256_v13  ;;  %v245_v22 = vld [vmem:[#allocation8 + $0x180] sm:$0xff] (%p59_p0)  ;;  %v246_v23 = vld [vmem:[#allocation8 + $0x188] sm:$0xff] (%p59_p0)  ;;  %v243_v24 = vld [vmem:[#allocation8 + $0x170] sm:$0xff] (%p59_p0) }
  0x2e   :  { %454 = vmatpush.xpose.msra.mxu0 %v253_v14  ;;  %519 = vmatpush.xpose.msra.mxu1 %v254_v15  ;;  %v244_v25 = vld [vmem:[#allocation8 + $0x178] sm:$0xff]  ;;  %v241_v26 = vld [vmem:[#allocation8 + $0x160] sm:$0xff]  ;;  %v242_v27 = vld [vmem:[#allocation8 + $0x168] sm:$0xff] }
  0x2f   :  { %v239_v28 = vld [vmem:[#allocation8 + $0x150] sm:$0xff]  ;;  %v240_v29 = vld [vmem:[#allocation8 + $0x158] sm:$0xff]  ;;  %v237_v30 = vld [vmem:[#allocation8 + $0x140] sm:$0xff] }
  0x30   :  { %v238_v31 = vld [vmem:[#allocation8 + $0x148] sm:$0xff]  ;;  %v235_v32 = vld [vmem:[#allocation8 + $0x130] sm:$0xff]  ;;  %v236_v33 = vld [vmem:[#allocation8 + $0x138] sm:$0xff] }
  0x31   :  { %585 = vmatpush.xpose.msra.mxu2 %v251_v16  ;;  %650 = vmatpush.xpose.msra.mxu3 %v252_v17  ;;  %v233_v34 = vld [vmem:[#allocation8 + $0x120] sm:$0xff]  ;;  %v234_v35 = vld [vmem:[#allocation8 + $0x128] sm:$0xff]  ;;  %v231_v36 = vld [vmem:[#allocation8 + $0x110] sm:$0xff] }
  0x32   :  { %455 = vmatpush.xpose.msra.mxu0 %v249_v18  ;;  %520 = vmatpush.xpose.msra.mxu1 %v250_v19  ;;  %v232_v37 = vld [vmem:[#allocation8 + $0x118] sm:$0xff]  ;;  %v229_v38 = vld [vmem:[#allocation8 + $0x100] sm:$0xff]  ;;  %v230_v39 = vld [vmem:[#allocation8 + $0x108] sm:$0xff] }
  0x33   :  { %v227_v40 = vld [vmem:[#allocation8 + $0xf0] sm:$0xff]  ;;  %v228_v41 = vld [vmem:[#allocation8 + $0xf8] sm:$0xff]  ;;  %v225_v42 = vld [vmem:[#allocation8 + $0xe0] sm:$0xff] }
  0x34   :  { %v226_v43 = vld [vmem:[#allocation8 + $0xe8] sm:$0xff]  ;;  %v223_v44 = vld [vmem:[#allocation8 + $0xd0] sm:$0xff]  ;;  %v224_v45 = vld [vmem:[#allocation8 + $0xd8] sm:$0xff] }
  0x35   :  { %586 = vmatpush.xpose.msra.mxu2 %v247_v20  ;;  %651 = vmatpush.xpose.msra.mxu3 %v248_v21  ;;  %v221_v46 = vld [vmem:[#allocation8 + $0xc0] sm:$0xff]  ;;  %v222_v47 = vld [vmem:[#allocation8 + $0xc8] sm:$0xff]  ;;  %v219_v48 = vld [vmem:[#allocation8 + $0xb0] sm:$0xff] }
  0x36   :  { %456 = vmatpush.xpose.msra.mxu0 %v245_v22  ;;  %521 = vmatpush.xpose.msra.mxu1 %v246_v23  ;;  %v220_v49 = vld [vmem:[#allocation8 + $0xb8] sm:$0xff]  ;;  %v217_v50 = vld [vmem:[#allocation8 + $0xa0] sm:$0xff]  ;;  %v218_v51 = vld [vmem:[#allocation8 + $0xa8] sm:$0xff] }
  0x37   :  { %v215_v52 = vld [vmem:[#allocation8 + $0x90] sm:$0xff]  ;;  %v216_v53 = vld [vmem:[#allocation8 + $0x98] sm:$0xff]  ;;  %v213_v54 = vld [vmem:[#allocation8 + $0x80] sm:$0xff] }
  0x38   :  { %v214_v55 = vld [vmem:[#allocation8 + $0x88] sm:$0xff]  ;;  %v211_v56 = vld [vmem:[#allocation8 + $0x70] sm:$0xff]  ;;  %v212_v57 = vld [vmem:[#allocation8 + $0x78] sm:$0xff] }
  0x39   :  { %587 = vmatpush.xpose.msra.mxu2 %v243_v24  ;;  %652 = vmatpush.xpose.msra.mxu3 %v244_v25  ;;  %v209_v58 = vld [vmem:[#allocation8 + $0x60] sm:$0xff]  ;;  %v210_v59 = vld [vmem:[#allocation8 + $0x68] sm:$0xff]  ;;  %v207_v60 = vld [vmem:[#allocation8 + $0x50] sm:$0xff] }
  0x3a   :  { %457 = vmatpush.xpose.msra.mxu0 %v241_v26  ;;  %522 = vmatpush.xpose.msra.mxu1 %v242_v27  ;;  %v208_v61 = vld [vmem:[#allocation8 + $0x58] sm:$0xff]  ;;  %v205_v62 = vld [vmem:[#allocation8 + $0x40] sm:$0xff]  ;;  %v206_v63 = vld [vmem:[#allocation8 + $0x48] sm:$0xff] }
  0x3b   :  { %v203_v0 = vld [vmem:[#allocation8 + $0x30] sm:$0xff]  ;;  %v204_v1 = vld [vmem:[#allocation8 + $0x38] sm:$0xff]  ;;  %v201_v2 = vld [vmem:[#allocation8 + $0x20] sm:$0xff] }
  0x3c   :  { %v202_v3 = vld [vmem:[#allocation8 + $0x28] sm:$0xff]  ;;  %v199_v4 = vld [vmem:[#allocation8 + $0x10] sm:$0xff]  ;;  %v200_v5 = vld [vmem:[#allocation8 + $0x18] sm:$0xff] }
  0x3d   :  { %588 = vmatpush.xpose.msra.mxu2 %v239_v28  ;;  %653 = vmatpush.xpose.msra.mxu3 %v240_v29  ;;  %v323_v6 = vld [vmem:[#allocation8 + $0x3f0] sm:$0xff]  ;;  %v197_v7 = vld [vmem:[#allocation8] sm:$0xff]  ;;  %v198_v8 = vld [vmem:[#allocation8 + $0x8] sm:$0xff] }
  0x3e   :  { %458 = vmatpush.xpose.msra.mxu0 %v237_v30  ;;  %523 = vmatpush.xpose.msra.mxu1 %v238_v31  ;;  %v324_v9 = vld [vmem:[#allocation8 + $0x3f8] sm:$0xff]  ;;  %v1857_v10 = vld [vmem:[#allocation2 + $0x10] sm:$0xff]  ;;  %v1861_v12 = vld [vmem:[#allocation2] sm:$0xff] }
  0x3f   :  { %v1859_v11 = vld [vmem:[#allocation2 + $0x18] sm:$0xff]  ;;  %v322_v13 = vld [vmem:[#allocation8 + $0x3e8] sm:$0xff]  ;;  %v321_v15 = vld [vmem:[#allocation8 + $0x3e0] sm:$0xff] }
  0x40   :  { %v1863_v14 = vld [vmem:[#allocation2 + $0x8] sm:$0xff]  ;;  %v319_v16 = vld [vmem:[#allocation8 + $0x3d0] sm:$0xff]  ;;  %v320_v17 = vld [vmem:[#allocation8 + $0x3d8] sm:$0xff] }
  0x41   :  { %589 = vmatpush.xpose.msra.mxu2 %v235_v32  ;;  %654 = vmatpush.xpose.msra.mxu3 %v236_v33  ;;  %v318_v18 = vld [vmem:[#allocation8 + $0x3c8] sm:$0xff]  ;;  %v317_v19 = vld [vmem:[#allocation8 + $0x3c0] sm:$0xff]  ;;  %v315_v20 = vld [vmem:[#allocation8 + $0x3b0] sm:$0xff] }
  0x42   :  { %459 = vmatpush.xpose.msra.mxu0 %v233_v34  ;;  %524 = vmatpush.xpose.msra.mxu1 %v234_v35  ;;  %v316_v21 = vld [vmem:[#allocation8 + $0x3b8] sm:$0xff]  ;;  %v1869_v22 = vld [vmem:[#allocation2 + $0x30] sm:$0xff]  ;;  %v1873_v24 = vld [vmem:[#allocation2 + $0x20] sm:$0xff] }
  0x43   :  { %v1871_v23 = vld [vmem:[#allocation2 + $0x38] sm:$0xff]  ;;  %v314_v25 = vld [vmem:[#allocation8 + $0x3a8] sm:$0xff]  ;;  %v313_v27 = vld [vmem:[#allocation8 + $0x3a0] sm:$0xff] }
  0x44   :  { %v1875_v26 = vld [vmem:[#allocation2 + $0x28] sm:$0xff]  ;;  %v311_v28 = vld [vmem:[#allocation8 + $0x390] sm:$0xff]  ;;  %v312_v29 = vld [vmem:[#allocation8 + $0x398] sm:$0xff] }
  0x45   :  { %590 = vmatpush.xpose.msra.mxu2 %v231_v36  ;;  %655 = vmatpush.xpose.msra.mxu3 %v232_v37  ;;  %v310_v30 = vld [vmem:[#allocation8 + $0x388] sm:$0xff]  ;;  %v309_v31 = vld [vmem:[#allocation8 + $0x380] sm:$0xff]  ;;  %v307_v32 = vld [vmem:[#allocation8 + $0x370] sm:$0xff] }
  0x46   :  { %460 = vmatpush.xpose.msra.mxu0 %v229_v38  ;;  %525 = vmatpush.xpose.msra.mxu1 %v230_v39  ;;  %v308_v33 = vld [vmem:[#allocation8 + $0x378] sm:$0xff]  ;;  %v1881_v34 = vld [vmem:[#allocation2 + $0x50] sm:$0xff]  ;;  %v1885_v36 = vld [vmem:[#allocation2 + $0x40] sm:$0xff] }
  0x47   :  { %v1883_v35 = vld [vmem:[#allocation2 + $0x58] sm:$0xff]  ;;  %v306_v37 = vld [vmem:[#allocation8 + $0x368] sm:$0xff]  ;;  %v305_v39 = vld [vmem:[#allocation8 + $0x360] sm:$0xff] }
  0x48   :  { %v1887_v38 = vld [vmem:[#allocation2 + $0x48] sm:$0xff] }
  0x49   :  { %591 = vmatpush.xpose.msra.mxu2 %v227_v40  ;;  %656 = vmatpush.xpose.msra.mxu3 %v228_v41  ;;  %v303_v40 = vld [vmem:[#allocation8 + $0x350] sm:$0xff]  ;;  %v304_v41 = vld [vmem:[#allocation8 + $0x358] sm:$0xff] }
  0x4a   :  { %461 = vmatpush.xpose.msra.mxu0 %v225_v42  ;;  %526 = vmatpush.xpose.msra.mxu1 %v226_v43  ;;  %v302_v42 = vld [vmem:[#allocation8 + $0x348] sm:$0xff]  ;;  %v301_v43 = vld [vmem:[#allocation8 + $0x340] sm:$0xff] }
  0x4d   :  { %592 = vmatpush.xpose.msra.mxu2 %v223_v44  ;;  %657 = vmatpush.xpose.msra.mxu3 %v224_v45  ;;  %v299_v44 = vld [vmem:[#allocation8 + $0x330] sm:$0xff]  ;;  %v300_v45 = vld [vmem:[#allocation8 + $0x338] sm:$0xff] }
  0x4e   :  { %462 = vmatpush.xpose.msra.mxu0 %v221_v46  ;;  %527 = vmatpush.xpose.msra.mxu1 %v222_v47  ;;  %v1893_v46 = vld [vmem:[#allocation2 + $0x70] sm:$0xff]  ;;  %v1895_v47 = vld [vmem:[#allocation2 + $0x78] sm:$0xff] }
  0x51   :  { %593 = vmatpush.xpose.msra.mxu2 %v219_v48  ;;  %658 = vmatpush.xpose.msra.mxu3 %v220_v49  ;;  %v1897_v48 = vld [vmem:[#allocation2 + $0x60] sm:$0xff]  ;;  %v298_v49 = vld [vmem:[#allocation8 + $0x328] sm:$0xff] }
  0x52   :  { %463 = vmatpush.xpose.msra.mxu0 %v217_v50  ;;  %528 = vmatpush.xpose.msra.mxu1 %v218_v51  ;;  %v1899_v50 = vld [vmem:[#allocation2 + $0x68] sm:$0xff]  ;;  %v297_v51 = vld [vmem:[#allocation8 + $0x320] sm:$0xff] }
  0x55   :  { %594 = vmatpush.xpose.msra.mxu2 %v215_v52  ;;  %659 = vmatpush.xpose.msra.mxu3 %v216_v53  ;;  %v295_v52 = vld [vmem:[#allocation8 + $0x310] sm:$0xff]  ;;  %v296_v53 = vld [vmem:[#allocation8 + $0x318] sm:$0xff] }
  0x56   :  { %464 = vmatpush.xpose.msra.mxu0 %v213_v54  ;;  %529 = vmatpush.xpose.msra.mxu1 %v214_v55  ;;  %v294_v54 = vld [vmem:[#allocation8 + $0x308] sm:$0xff]  ;;  %v293_v55 = vld [vmem:[#allocation8 + $0x300] sm:$0xff] }
  0x59   :  { %595 = vmatpush.xpose.msra.mxu2 %v211_v56  ;;  %660 = vmatpush.xpose.msra.mxu3 %v212_v57  ;;  %v1905_v56 = vld [vmem:[#allocation2 + $0x90] sm:$0xff]  ;;  %v1907_v57 = vld [vmem:[#allocation2 + $0x98] sm:$0xff] }
  0x5a   :  { %465 = vmatpush.xpose.msra.mxu0 %v209_v58  ;;  %530 = vmatpush.xpose.msra.mxu1 %v210_v59  ;;  %v1909_v58 = vld [vmem:[#allocation2 + $0x80] sm:$0xff]  ;;  %v1911_v59 = vld [vmem:[#allocation2 + $0x88] sm:$0xff] }
  0x5d   :  { %596 = vmatpush.xpose.msra.mxu2 %v207_v60  ;;  %661 = vmatpush.xpose.msra.mxu3 %v208_v61  ;;  %v291_v60 = vld [vmem:[#allocation8 + $0x2f0] sm:$0xff]  ;;  %v292_v61 = vld [vmem:[#allocation8 + $0x2f8] sm:$0xff] }
  0x5e   :  { %466 = vmatpush.xpose.msra.mxu0 %v205_v62  ;;  %531 = vmatpush.xpose.msra.mxu1 %v206_v63  ;;  %v289_v62 = vld [vmem:[#allocation8 + $0x2e0] sm:$0xff]  ;;  %v290_v63 = vld [vmem:[#allocation8 + $0x2e8] sm:$0xff] }
  0x61   :  { %597 = vmatpush.xpose.msra.mxu2 %v203_v0  ;;  %662 = vmatpush.xpose.msra.mxu3 %v204_v1  ;;  %v1917_v0 = vld [vmem:[#allocation2 + $0xb0] sm:$0xff]  ;;  %v1919_v1 = vld [vmem:[#allocation2 + $0xb8] sm:$0xff] }
  0x62   :  { %467 = vmatpush.xpose.msra.mxu0 %v201_v2  ;;  %532 = vmatpush.xpose.msra.mxu1 %v202_v3  ;;  %v1921_v2 = vld [vmem:[#allocation2 + $0xa0] sm:$0xff]  ;;  %v1923_v3 = vld [vmem:[#allocation2 + $0xa8] sm:$0xff] }
  0x65   :  { %598 = vmatpush.xpose.msra.mxu2 %v199_v4  ;;  %663 = vmatpush.xpose.msra.mxu3 %v200_v5  ;;  %v287_v4 = vld [vmem:[#allocation8 + $0x2d0] sm:$0xff]  ;;  %v288_v5 = vld [vmem:[#allocation8 + $0x2d8] sm:$0xff] }
  0x66   :  { %468 = vmatpush.xpose.msra.mxu0 %v197_v7  ;;  %533 = vmatpush.xpose.msra.mxu1 %v198_v8  ;;  %v286_v7 = vld [vmem:[#allocation8 + $0x2c8] sm:$0xff]  ;;  %v1929_v8 = vld [vmem:[#allocation2 + $0xd0] sm:$0xff] }
  0x68   :  { %599 = vmatmul.f32.vlgmr.msra.gmra.mxu2 %v1857_v10  ;;  %664 = vmatmul.f32.vlgmr.msra.gmra.mxu3 %v1859_v11 }
  0x69   :  { %843 = vmatpush.xpose.msrb.mxu2 %v323_v6  ;;  %908 = vmatpush.xpose.msrb.mxu3 %v324_v9  ;;  %v285_v6 = vld [vmem:[#allocation8 + $0x2c0] sm:$0xff]  ;;  %v1931_v9 = vld [vmem:[#allocation2 + $0xd8] sm:$0xff] }
  0x6a   :  { %469 = vmatmul.f32.vlgmr.msra.gmra.mxu0 %v1861_v12  ;;  %778 = vmatpush.xpose.msrb.mxu1 %v322_v13  ;;  %v1933_v13 = vld [vmem:[#allocation2 + $0xc0] sm:$0xff] }
  0x6b   :  { %534 = vmatmul.f32.vlgmr.msra.gmra.mxu1 %v1863_v14  ;;  %713 = vmatpush.xpose.msrb.mxu0 %v321_v15  ;;  %v1935_v15 = vld [vmem:[#allocation2 + $0xc8] sm:$0xff] }
  0x6d   :  { %844 = vmatpush.xpose.msrb.mxu2 %v319_v16  ;;  %909 = vmatpush.xpose.msrb.mxu3 %v320_v17  ;;  %v283_v16 = vld [vmem:[#allocation8 + $0x2b0] sm:$0xff]  ;;  %v284_v17 = vld [vmem:[#allocation8 + $0x2b8] sm:$0xff] }
  0x6e   :  { %779 = vmatpush.xpose.msrb.mxu1 %v318_v18  ;;  %v281_v18 = vld [vmem:[#allocation8 + $0x2a0] sm:$0xff] }
  0x6f   :  { %714 = vmatpush.xpose.msrb.mxu0 %v317_v19  ;;  %v282_v19 = vld [vmem:[#allocation8 + $0x2a8] sm:$0xff] }
  0x70   :  { %602 = vmatmul.f32.gmra.mxu2 %v1869_v22  ;;  %667 = vmatmul.f32.gmra.mxu3 %v1871_v23 }
  0x71   :  { %845 = vmatpush.xpose.msrb.mxu2 %v315_v20  ;;  %910 = vmatpush.xpose.msrb.mxu3 %v316_v21  ;;  %v1941_v20 = vld [vmem:[#allocation2 + $0xf0] sm:$0xff]  ;;  %v1943_v21 = vld [vmem:[#allocation2 + $0xf8] sm:$0xff] }
  0x72   :  { %472 = vmatmul.f32.gmra.mxu0 %v1873_v24  ;;  %780 = vmatpush.xpose.msrb.mxu1 %v314_v25  ;;  %v1945_v25 = vld [vmem:[#allocation2 + $0xe0] sm:$0xff] }
  0x73   :  { %537 = vmatmul.f32.gmra.mxu1 %v1875_v26  ;;  %715 = vmatpush.xpose.msrb.mxu0 %v313_v27  ;;  %v1947_v27 = vld [vmem:[#allocation2 + $0xe8] sm:$0xff] }
  0x75   :  { %846 = vmatpush.xpose.msrb.mxu2 %v311_v28  ;;  %911 = vmatpush.xpose.msrb.mxu3 %v312_v29  ;;  %v279_v28 = vld [vmem:[#allocation8 + $0x290] sm:$0xff]  ;;  %v280_v29 = vld [vmem:[#allocation8 + $0x298] sm:$0xff] }
  0x76   :  { %781 = vmatpush.xpose.msrb.mxu1 %v310_v30  ;;  %v277_v30 = vld [vmem:[#allocation8 + $0x280] sm:$0xff] }
  0x77   :  { %716 = vmatpush.xpose.msrb.mxu0 %v309_v31  ;;  %v278_v31 = vld [vmem:[#allocation8 + $0x288] sm:$0xff] }
  0x78   :  { %605 = vmatmul.f32.gmra.mxu2 %v1881_v34  ;;  %670 = vmatmul.f32.gmra.mxu3 %v1883_v35 }
  0x79   :  { %847 = vmatpush.xpose.msrb.mxu2 %v307_v32  ;;  %912 = vmatpush.xpose.msrb.mxu3 %v308_v33  ;;  %v1953_v32 = vld [vmem:[#allocation2 + $0x110] sm:$0xff]  ;;  %v1955_v33 = vld [vmem:[#allocation2 + $0x118] sm:$0xff] }
  0x7a   :  { %475 = vmatmul.f32.gmra.mxu0 %v1885_v36  ;;  %782 = vmatpush.xpose.msrb.mxu1 %v306_v37  ;;  %v1957_v37 = vld [vmem:[#allocation2 + $0x100] sm:$0xff] }
  0x7b   :  { %540 = vmatmul.f32.gmra.mxu1 %v1887_v38  ;;  %717 = vmatpush.xpose.msrb.mxu0 %v305_v39  ;;  %v1959_v39 = vld [vmem:[#allocation2 + $0x108] sm:$0xff] }
  0x7d   :  { %848 = vmatpush.xpose.msrb.mxu2 %v303_v40  ;;  %913 = vmatpush.xpose.msrb.mxu3 %v304_v41  ;;  %v275_v40 = vld [vmem:[#allocation8 + $0x270] sm:$0xff]  ;;  %v276_v41 = vld [vmem:[#allocation8 + $0x278] sm:$0xff] }
  0x7e   :  { %783 = vmatpush.xpose.msrb.mxu1 %v302_v42  ;;  %v273_v42 = vld [vmem:[#allocation8 + $0x260] sm:$0xff] }
  0x7f   :  { %718 = vmatpush.xpose.msrb.mxu0 %v301_v43  ;;  %v274_v43 = vld [vmem:[#allocation8 + $0x268] sm:$0xff] }
  0x80   :  { %608 = vmatmul.f32.gmra.mxu2 %v1893_v46  ;;  %673 = vmatmul.f32.gmra.mxu3 %v1895_v47 }
  0x81   :  { %849 = vmatpush.xpose.msrb.mxu2 %v299_v44  ;;  %914 = vmatpush.xpose.msrb.mxu3 %v300_v45  ;;  %v1965_v44 = vld [vmem:[#allocation2 + $0x130] sm:$0xff]  ;;  %v1967_v45 = vld [vmem:[#allocation2 + $0x138] sm:$0xff] }
  0x82   :  { %478 = vmatmul.f32.gmra.mxu0 %v1897_v48  ;;  %784 = vmatpush.xpose.msrb.mxu1 %v298_v49  ;;  %v1969_v49 = vld [vmem:[#allocation2 + $0x120] sm:$0xff] }
  0x83   :  { %543 = vmatmul.f32.gmra.mxu1 %v1899_v50  ;;  %719 = vmatpush.xpose.msrb.mxu0 %v297_v51  ;;  %v1971_v51 = vld [vmem:[#allocation2 + $0x128] sm:$0xff] }
  0x85   :  { %850 = vmatpush.xpose.msrb.mxu2 %v295_v52  ;;  %915 = vmatpush.xpose.msrb.mxu3 %v296_v53  ;;  %v271_v52 = vld [vmem:[#allocation8 + $0x250] sm:$0xff]  ;;  %v272_v53 = vld [vmem:[#allocation8 + $0x258] sm:$0xff] }
  0x86   :  { %785 = vmatpush.xpose.msrb.mxu1 %v294_v54  ;;  %v269_v54 = vld [vmem:[#allocation8 + $0x240] sm:$0xff] }
  0x87   :  { %720 = vmatpush.xpose.msrb.mxu0 %v293_v55  ;;  %v270_v55 = vld [vmem:[#allocation8 + $0x248] sm:$0xff] }
  0x88   :  { %611 = vmatmul.f32.gmra.mxu2 %v1905_v56  ;;  %676 = vmatmul.f32.gmra.mxu3 %v1907_v57 }
  0x89   :  { %851 = vmatpush.xpose.msrb.mxu2 %v291_v60  ;;  %916 = vmatpush.xpose.msrb.mxu3 %v292_v61  ;;  %v1977_v60 = vld [vmem:[#allocation2 + $0x150] sm:$0xff]  ;;  %v1979_v61 = vld [vmem:[#allocation2 + $0x158] sm:$0xff] }
  0x8a   :  { %481 = vmatmul.f32.gmra.mxu0 %v1909_v58  ;;  %786 = vmatpush.xpose.msrb.mxu1 %v290_v63  ;;  %v1983_v63 = vld [vmem:[#allocation2 + $0x148] sm:$0xff] }
  0x8b   :  { %546 = vmatmul.f32.gmra.mxu1 %v1911_v59  ;;  %721 = vmatpush.xpose.msrb.mxu0 %v289_v62  ;;  %v1981_v62 = vld [vmem:[#allocation2 + $0x140] sm:$0xff] }
  0x8d   :  { %852 = vmatpush.xpose.msrb.mxu2 %v287_v4  ;;  %917 = vmatpush.xpose.msrb.mxu3 %v288_v5  ;;  %v267_v4 = vld [vmem:[#allocation8 + $0x230] sm:$0xff]  ;;  %v268_v5 = vld [vmem:[#allocation8 + $0x238] sm:$0xff] }
  0x8e   :  { %787 = vmatpush.xpose.msrb.mxu1 %v286_v7  ;;  %v266_v7 = vld [vmem:[#allocation8 + $0x228] sm:$0xff] }
  0x8f   :  { %722 = vmatpush.xpose.msrb.mxu0 %v285_v6  ;;  %v265_v6 = vld [vmem:[#allocation8 + $0x220] sm:$0xff] }
  0x90   :  { %614 = vmatmul.f32.gmra.mxu2 %v1917_v0  ;;  %679 = vmatmul.f32.gmra.mxu3 %v1919_v1 }
  0x91   :  { %853 = vmatpush.xpose.msrb.mxu2 %v283_v16  ;;  %918 = vmatpush.xpose.msrb.mxu3 %v284_v17  ;;  %v1989_v16 = vld [vmem:[#allocation2 + $0x170] sm:$0xff]  ;;  %v1991_v17 = vld [vmem:[#allocation2 + $0x178] sm:$0xff] }
  0x92   :  { %484 = vmatmul.f32.gmra.mxu0 %v1921_v2  ;;  %788 = vmatpush.xpose.msrb.mxu1 %v282_v19  ;;  %v1995_v19 = vld [vmem:[#allocation2 + $0x168] sm:$0xff] }
  0x93   :  { %549 = vmatmul.f32.gmra.mxu1 %v1923_v3  ;;  %723 = vmatpush.xpose.msrb.mxu0 %v281_v18  ;;  %v1993_v18 = vld [vmem:[#allocation2 + $0x160] sm:$0xff] }
  0x95   :  { %854 = vmatpush.xpose.msrb.mxu2 %v279_v28  ;;  %919 = vmatpush.xpose.msrb.mxu3 %v280_v29  ;;  %v263_v28 = vld [vmem:[#allocation8 + $0x210] sm:$0xff]  ;;  %v264_v29 = vld [vmem:[#allocation8 + $0x218] sm:$0xff] }
  0x96   :  { %789 = vmatpush.xpose.msrb.mxu1 %v278_v31  ;;  %v262_v31 = vld [vmem:[#allocation8 + $0x208] sm:$0xff] }
  0x97   :  { %724 = vmatpush.xpose.msrb.mxu0 %v277_v30  ;;  %v261_v30 = vld [vmem:[#allocation8 + $0x200] sm:$0xff] }
  0x98   :  { %617 = vmatmul.f32.gmra.mxu2 %v1929_v8  ;;  %682 = vmatmul.f32.gmra.mxu3 %v1931_v9 }
  0x99   :  { %855 = vmatpush.xpose.msrb.mxu2 %v275_v40  ;;  %920 = vmatpush.xpose.msrb.mxu3 %v276_v41  ;;  %v2001_v40 = vld [vmem:[#allocation2 + $0x190] sm:$0xff]  ;;  %v2003_v41 = vld [vmem:[#allocation2 + $0x198] sm:$0xff] }
  0x9a   :  { %487 = vmatmul.f32.gmra.mxu0 %v1933_v13  ;;  %790 = vmatpush.xpose.msrb.mxu1 %v274_v43  ;;  %v2007_v43 = vld [vmem:[#allocation2 + $0x188] sm:$0xff] }
  0x9b   :  { %552 = vmatmul.f32.gmra.mxu1 %v1935_v15  ;;  %725 = vmatpush.xpose.msrb.mxu0 %v273_v42  ;;  %v2005_v42 = vld [vmem:[#allocation2 + $0x180] sm:$0xff] }
  0x9d   :  { %856 = vmatpush.xpose.msrb.mxu2 %v271_v52  ;;  %921 = vmatpush.xpose.msrb.mxu3 %v272_v53  ;;  %v387_v52 = vld [vmem:[#allocation8 + $0x5f0] sm:$0xff]  ;;  %v388_v53 = vld [vmem:[#allocation8 + $0x5f8] sm:$0xff] }
  0x9e   :  { %791 = vmatpush.xpose.msrb.mxu1 %v270_v55  ;;  %v386_v55 = vld [vmem:[#allocation8 + $0x5e8] sm:$0xff] }
  0x9f   :  { %726 = vmatpush.xpose.msrb.mxu0 %v269_v54  ;;  %v385_v54 = vld [vmem:[#allocation8 + $0x5e0] sm:$0xff] }
  0xa0   :  { %620 = vmatmul.f32.gmra.mxu2 %v1941_v20  ;;  %685 = vmatmul.f32.gmra.mxu3 %v1943_v21 }
  0xa1   :  { %857 = vmatpush.xpose.msrb.mxu2 %v267_v4  ;;  %922 = vmatpush.xpose.msrb.mxu3 %v268_v5  ;;  %v2013_v4 = vld [vmem:[#allocation2 + $0x1b0] sm:$0xff]  ;;  %v2015_v5 = vld [vmem:[#allocation2 + $0x1b8] sm:$0xff] }
  0xa2   :  { %490 = vmatmul.f32.gmra.mxu0 %v1945_v25  ;;  %792 = vmatpush.xpose.msrb.mxu1 %v266_v7  ;;  %2404 = vst [vmem:[#allocation15_spill] sm:$0xff] %v2015_v5  ;;  %v2019_v7 = vld [vmem:[#allocation2 + $0x1a8] sm:$0xff] }
  0xa3   :  { %555 = vmatmul.f32.gmra.mxu1 %v1947_v27  ;;  %727 = vmatpush.xpose.msrb.mxu0 %v265_v6  ;;  %v2017_v6 = vld [vmem:[#allocation2 + $0x1a0] sm:$0xff]  ;;  %2406 = vst [vmem:[#allocation17_spill] sm:$0xff] %v2019_v7 }
  0xa4   :  { %2405 = vst [vmem:[#allocation16_spill] sm:$0xff] %v2017_v6 }
  0xa5   :  { %858 = vmatpush.xpose.msrb.mxu2 %v263_v28  ;;  %923 = vmatpush.xpose.msrb.mxu3 %v264_v29  ;;  %v383_v28 = vld [vmem:[#allocation8 + $0x5d0] sm:$0xff]  ;;  %v384_v29 = vld [vmem:[#allocation8 + $0x5d8] sm:$0xff] }
  0xa6   :  { %793 = vmatpush.xpose.msrb.mxu1 %v262_v31  ;;  %v382_v31 = vld [vmem:[#allocation8 + $0x5c8] sm:$0xff] }
  0xa7   :  { %728 = vmatpush.xpose.msrb.mxu0 %v261_v30  ;;  %v381_v30 = vld [vmem:[#allocation8 + $0x5c0] sm:$0xff] }
  0xa8   :  { %623 = vmatmul.f32.gmra.mxu2 %v1953_v32  ;;  %688 = vmatmul.f32.gmra.mxu3 %v1955_v33 }
  0xa9   :  { %1103 = vmatpush.xpose.msra.mxu2 %v387_v52  ;;  %1168 = vmatpush.xpose.msra.mxu3 %v388_v53  ;;  %v2025_v52 = vld [vmem:[#allocation2 + $0x1d0] sm:$0xff]  ;;  %v2027_v53 = vld [vmem:[#allocation2 + $0x1d8] sm:$0xff] }
  0xaa   :  { %493 = vmatmul.f32.gmra.mxu0 %v1957_v37  ;;  %1038 = vmatpush.xpose.msra.mxu1 %v386_v55  ;;  %2407 = vst [vmem:[#allocation18_spill] sm:$0xff] %v2025_v52  ;;  %v2031_v55 = vld [vmem:[#allocation2 + $0x1c8] sm:$0xff] }
  0xab   :  { %558 = vmatmul.f32.gmra.mxu1 %v1959_v39  ;;  %973 = vmatpush.xpose.msra.mxu0 %v385_v54  ;;  %2408 = vst [vmem:[#allocation19_spill] sm:$0xff] %v2027_v53  ;;  %v2029_v54 = vld [vmem:[#allocation2 + $0x1c0] sm:$0xff] }
  0xac   :  { %2409 = vst [vmem:[#allocation20_spill] sm:$0xff] %v2029_v54 }
  0xad   :  { %1104 = vmatpush.xpose.msra.mxu2 %v383_v28  ;;  %1169 = vmatpush.xpose.msra.mxu3 %v384_v29  ;;  %2410 = vst [vmem:[#allocation21_spill] sm:$0xff] %v2031_v55  ;;  %v379_v28 = vld [vmem:[#allocation8 + $0x5b0] sm:$0xff]  ;;  %v377_v29 = vld [vmem:[#allocation8 + $0x5a0] sm:$0xff] }
  0xae   :  { %1039 = vmatpush.xpose.msra.mxu1 %v382_v31  ;;  %v2039_v31 = vld [vmem:[#allocation2 + $0x1f8] sm:$0xff] }
  0xaf   :  { %974 = vmatpush.xpose.msra.mxu0 %v381_v30  ;;  %v2037_v30 = vld [vmem:[#allocation2 + $0x1f0] sm:$0xff]  ;;  %2412 = vst [vmem:[#allocation23_spill] sm:$0xff] %v2039_v31 }
  0xb0   :  { %626 = vmatmul.f32.gmra.mxu2 %v1965_v44  ;;  %691 = vmatmul.f32.gmra.mxu3 %v1967_v45  ;;  %2411 = vst [vmem:[#allocation22_spill] sm:$0xff] %v2037_v30 }
  0xb1   :  { %1105 = vmatpush.xpose.msra.mxu2 %v379_v28  ;;  %v375_v28 = vld [vmem:[#allocation8 + $0x590] sm:$0xff] }
  0xb2   :  { %496 = vmatmul.f32.gmra.mxu0 %v1969_v49 }
  0xb3   :  { %561 = vmatmul.f32.gmra.mxu1 %v1971_v51  ;;  %975 = vmatpush.xpose.msra.mxu0 %v377_v29 }
  0xb5   :  { %1106 = vmatpush.xpose.msra.mxu2 %v375_v28 }
  0xb8   :  { %629 = vmatmul.f32.gmra.mxu2 %v1977_v60  ;;  %694 = vmatmul.f32.gmra.mxu3 %v1979_v61 }
  0xba   :  { %499 = vmatmul.f32.gmra.mxu0 %v1981_v62 }
  0xbb   :  { %564 = vmatmul.f32.gmra.mxu1 %v1983_v63 }
  0xc0   :  { %632 = vmatmul.f32.gmra.mxu2 %v1989_v16  ;;  %697 = vmatmul.f32.gmra.mxu3 %v1991_v17 }
  0xc2   :  { %502 = vmatmul.f32.gmra.mxu0 %v1993_v18 }
  0xc3   :  { %567 = vmatmul.f32.gmra.mxu1 %v1995_v19 }
  0xc8   :  { %635 = vmatmul.f32.gmra.mxu2 %v2001_v40  ;;  %700 = vmatmul.f32.gmra.mxu3 %v2003_v41 }
  0xca   :  { %505 = vmatmul.f32.gmra.mxu0 %v2005_v42 }
  0xcb   :  { %570 = vmatmul.f32.gmra.mxu1 %v2007_v43 }
  0xd0   :  { %638 = vmatmul.f32.gmra.mxu2 %v2013_v4  ;;  %703 = vmatmul.f32.gmra.mxu3 %v2015_v5  ;;  %v2041_v5 = vld [vmem:[#allocation2 + $0x1e0] sm:$0xff] }
  0xd1   :  { %2413 = vst [vmem:[#allocation24_spill] sm:$0xff] %v2041_v5 }
  0xd2   :  { %508 = vmatmul.f32.gmra.mxu0 %v2017_v6  ;;  %v380_v6 = vld [vmem:[#allocation8 + $0x5b8] sm:$0xff] }
  0xd3   :  { %573 = vmatmul.f32.gmra.mxu1 %v2019_v7  ;;  %1170 = vmatpush.xpose.msra.mxu3 %v380_v6  ;;  %v378_v7 = vld [vmem:[#allocation8 + $0x5a8] sm:$0xff]  ;;  %v373_v6 = vld [vmem:[#allocation8 + $0x580] sm:$0xff] }
  0xd4   :  { %1040 = vmatpush.xpose.msra.mxu1 %v378_v7  ;;  %976 = vmatpush.xpose.msra.mxu0 %v373_v6  ;;  %v369_v6 = vld [vmem:[#allocation8 + $0x560] sm:$0xff] }
  0xd8   :  { %641 = vmatmul.f32.gmra.mxu2 %v2025_v52  ;;  %706 = vmatmul.f32.gmra.mxu3 %v2027_v53  ;;  %v2043_v52 = vld [vmem:[#allocation2 + $0x1e8] sm:$0xff] }
  0xd9   :  { %2414 = vst [vmem:[#allocation25_spill] sm:$0xff] %v2043_v52  ;;  %977 = vmatpush.xpose.msra.mxu0 %v369_v6 }
  0xda   :  { %511 = vmatmul.f32.gmra.mxu0 %v2029_v54  ;;  %v376_v54 = vld [vmem:[#allocation8 + $0x598] sm:$0xff] }
  0xdb   :  { %576 = vmatmul.f32.gmra.mxu1 %v2031_v55  ;;  %1171 = vmatpush.xpose.msra.mxu3 %v376_v54  ;;  %v374_v55 = vld [vmem:[#allocation8 + $0x588] sm:$0xff] }
  0xdc   :  { %1041 = vmatpush.xpose.msra.mxu1 %v374_v55  ;;  %v370_v55 = vld [vmem:[#allocation8 + $0x568] sm:$0xff] }
  0xe0   :  { %644 = vmatmul.f32.gmra.mxu2 %v2037_v30  ;;  %709 = vmatmul.f32.gmra.mxu3 %v2039_v31  ;;  %v371_v31 = vld [vmem:[#allocation8 + $0x570] sm:$0xff]  ;;  %v372_v30 = vld [vmem:[#allocation8 + $0x578] sm:$0xff] }
  0xe1   :  { %1107 = vmatpush.xpose.msra.mxu2 %v371_v31  ;;  %1172 = vmatpush.xpose.msra.mxu3 %v372_v30  ;;  %v368_v31 = vld [vmem:[#allocation8 + $0x558] sm:$0xff] }
  0xe2   :  { %514 = vmatmul.f32.gmra.mxu0 %v2041_v5  ;;  %1042 = vmatpush.xpose.msra.mxu1 %v370_v55 }
  0xe3   :  { %579 = vmatmul.f32.gmra.mxu1 %v2043_v52 }
  0xe5   :  { %1173 = vmatpush.xpose.msra.mxu3 %v368_v31  ;;  %v360_v31 = vld [vmem:[#allocation8 + $0x518] sm:$0xff] }
  0xe7   :  { %v470_v7 = vpop.f32.mrf.mxu0 }
  0xe8   :  { %v535_v29 = vpop.f32.mrf.mxu1  ;;  %859 = vmatmul.f32.vlgmr.msrb.gmra.mxu2 %v1857_v10  ;;  %924 = vmatmul.f32.vlgmr.msrb.gmra.mxu3 %v1859_v11 }
  0xe9   :  { %v536_v53 = vadd.f32 %v535_v29, %v470_v7  ;;  %v366_v29 = vld [vmem:[#allocation8 + $0x548] sm:$0xff] }
  0xea   :  { %729 = vmatmul.f32.vlgmr.msrb.gmra.mxu0 %v1861_v12  ;;  %v367_v12 = vld [vmem:[#allocation8 + $0x550] sm:$0xff]  ;;  %1043 = vmatpush.xpose.msra.mxu1 %v366_v29 }
  0xeb   :  { %794 = vmatmul.f32.vlgmr.msrb.gmra.mxu1 %v1863_v14  ;;  %v600_v54 = vpop.f32.mrf.mxu2  ;;  %v665_v28 = vpop.f32.mrf.mxu3  ;;  %1108 = vmatpush.xpose.msra.mxu2 %v367_v12 }
  0xec   :  { %v601_v52 = vadd.f32 %v600_v54, %v536_v53 }
  0xee   :  { %v666_v5 = vadd.f32 %v665_v28, %v601_v52  ;;  %v365_v52 = vld [vmem:[#allocation8 + $0x540] sm:$0xff]  ;;  %v364_v28 = vld [vmem:[#allocation8 + $0x538] sm:$0xff] }
  0xef   :  { %v473_v10 = vpop.f32.mrf.mxu0  ;;  %978 = vmatpush.xpose.msra.mxu0 %v365_v52  ;;  %1174 = vmatpush.xpose.msra.mxu3 %v364_v28  ;;  %v358_v52 = vld [vmem:[#allocation8 + $0x508] sm:$0xff] }
  0xf0   :  { %v538_v7 = vpop.f32.mrf.mxu1  ;;  %1493 = vst [vmem:[#allocation10] sm:$0xff] %v666_v5  ;;  %862 = vmatmul.f32.gmra.mxu2 %v1869_v22  ;;  %927 = vmatmul.f32.gmra.mxu3 %v1871_v23  ;;  %v354_v28 = vld [vmem:[#allocation8 + $0x4e8] sm:$0xff] }
  0xf1   :  { %v539_v11 = vadd.f32 %v538_v7, %v473_v10  ;;  %v361_v10 = vld [vmem:[#allocation8 + $0x520] sm:$0xff]  ;;  %v362_v7 = vld [vmem:[#allocation8 + $0x528] sm:$0xff] }
  0xf2   :  { %732 = vmatmul.f32.gmra.mxu0 %v1873_v24  ;;  %v363_v24 = vld [vmem:[#allocation8 + $0x530] sm:$0xff]  ;;  %1044 = vmatpush.xpose.msra.mxu1 %v362_v7 }
  0xf3   :  { %797 = vmatmul.f32.gmra.mxu1 %v1875_v26  ;;  %v603_v14 = vpop.f32.mrf.mxu2  ;;  %v668_v53 = vpop.f32.mrf.mxu3  ;;  %1109 = vmatpush.xpose.msra.mxu2 %v363_v24  ;;  %v353_v24 = vld [vmem:[#allocation8 + $0x4e0] sm:$0xff] }
  0xf4   :  { %v604_v30 = vadd.f32 %v603_v14, %v539_v11  ;;  %979 = vmatpush.xpose.msra.mxu0 %v361_v10  ;;  %1175 = vmatpush.xpose.msra.mxu3 %v360_v31 }
  0xf6   :  { %v669_v5 = vadd.f32 %v668_v53, %v604_v30  ;;  %v357_v30 = vld [vmem:[#allocation8 + $0x500] sm:$0xff]  ;;  %1045 = vmatpush.xpose.msra.mxu1 %v358_v52 }
  0xf7   :  { %v476_v22 = vpop.f32.mrf.mxu0 }
  0xf8   :  { %v541_v54 = vpop.f32.mrf.mxu1  ;;  %1497 = vst [vmem:[#allocation10 + $0x20] sm:$0xff] %v669_v5  ;;  %865 = vmatmul.f32.gmra.mxu2 %v1881_v34  ;;  %930 = vmatmul.f32.gmra.mxu3 %v1883_v35 }
  0xf9   :  { %v542_v23 = vadd.f32 %v541_v54, %v476_v22  ;;  %980 = vmatpush.xpose.msra.mxu0 %v357_v30  ;;  %v356_v22 = vld [vmem:[#allocation8 + $0x4f8] sm:$0xff] }
  0xfa   :  { %735 = vmatmul.f32.gmra.mxu0 %v1885_v36  ;;  %v359_v36 = vld [vmem:[#allocation8 + $0x510] sm:$0xff]  ;;  %1176 = vmatpush.xpose.msra.mxu3 %v356_v22 }
  0xfb   :  { %800 = vmatmul.f32.gmra.mxu1 %v1887_v38  ;;  %v606_v26 = vpop.f32.mrf.mxu2  ;;  %v671_v6 = vpop.f32.mrf.mxu3  ;;  %1110 = vmatpush.xpose.msra.mxu2 %v359_v36  ;;  %v348_v36 = vld [vmem:[#allocation8 + $0x4b8] sm:$0xff] }
  0xfc   :  { %v607_v55 = vadd.f32 %v606_v26, %v542_v23  ;;  %1046 = vmatpush.xpose.msra.mxu1 %v354_v28  ;;  %v337_v28 = vld [vmem:[#allocation8 + $0x460] sm:$0xff] }
  0xfd   :  { %981 = vmatpush.xpose.msra.mxu0 %v353_v24 }
  0xfe   :  { %v672_v11 = vadd.f32 %v671_v6, %v607_v55  ;;  %v352_v55 = vld [vmem:[#allocation8 + $0x4d8] sm:$0xff] }
  0xff   :  { %v479_v34 = vpop.f32.mrf.mxu0  ;;  %1177 = vmatpush.xpose.msra.mxu3 %v352_v55 }
 0x100   :  { %v544_v12 = vpop.f32.mrf.mxu1  ;;  %1501 = vst [vmem:[#allocation10 + $0x40] sm:$0xff] %v672_v11  ;;  %868 = vmatmul.f32.gmra.mxu2 %v1893_v46  ;;  %933 = vmatmul.f32.gmra.mxu3 %v1895_v47  ;;  %v349_v11 = vld [vmem:[#allocation8 + $0x4c0] sm:$0xff] }
 0x101   :  { %v545_v35 = vadd.f32 %v544_v12, %v479_v34  ;;  %v350_v34 = vld [vmem:[#allocation8 + $0x4c8] sm:$0xff]  ;;  %982 = vmatpush.xpose.msra.mxu0 %v349_v11 }
 0x102   :  { %738 = vmatmul.f32.gmra.mxu0 %v1897_v48  ;;  %v355_v48 = vld [vmem:[#allocation8 + $0x4f0] sm:$0xff]  ;;  %1047 = vmatpush.xpose.msra.mxu1 %v350_v34  ;;  %v332_v34 = vld [vmem:[#allocation8 + $0x438] sm:$0xff] }
 0x103   :  { %803 = vmatmul.f32.gmra.mxu1 %v1899_v50  ;;  %v609_v38 = vpop.f32.mrf.mxu2  ;;  %v674_v14 = vpop.f32.mrf.mxu3  ;;  %1111 = vmatpush.xpose.msra.mxu2 %v355_v48  ;;  %v342_v48 = vld [vmem:[#allocation8 + $0x488] sm:$0xff] }
 0x104   :  { %v610_v53 = vadd.f32 %v609_v38, %v545_v35  ;;  %1178 = vmatpush.xpose.msra.mxu3 %v348_v36 }
 0x106   :  { %v675_v29 = vadd.f32 %v674_v14, %v610_v53  ;;  %v345_v14 = vld [vmem:[#allocation8 + $0x4a0] sm:$0xff]  ;;  %v346_v53 = vld [vmem:[#allocation8 + $0x4a8] sm:$0xff] }
 0x107   :  { %v482_v46 = vpop.f32.mrf.mxu0  ;;  %983 = vmatpush.xpose.msra.mxu0 %v345_v14  ;;  %1048 = vmatpush.xpose.msra.mxu1 %v346_v53  ;;  %v325_v14 = vld [vmem:[#allocation8 + $0x400] sm:$0xff]  ;;  %v326_v53 = vld [vmem:[#allocation8 + $0x408] sm:$0xff] }
 0x108   :  { %v547_v5 = vpop.f32.mrf.mxu1  ;;  %1505 = vst [vmem:[#allocation10 + $0x60] sm:$0xff] %v675_v29  ;;  %871 = vmatmul.f32.gmra.mxu2 %v1905_v56  ;;  %936 = vmatmul.f32.gmra.mxu3 %v1907_v57  ;;  %v344_v29 = vld [vmem:[#allocation8 + $0x498] sm:$0xff] }
 0x109   :  { %v548_v47 = vadd.f32 %v547_v5, %v482_v46  ;;  %1179 = vmatpush.xpose.msra.mxu3 %v344_v29  ;;  %v449_v29 = vld [vmem:[#allocation8 + $0x7e0] sm:$0xff] }
 0x10a   :  { %741 = vmatmul.f32.gmra.mxu0 %v1909_v58  ;;  %v351_v58 = vld [vmem:[#allocation8 + $0x4d0] sm:$0xff] }
 0x10b   :  { %806 = vmatmul.f32.gmra.mxu1 %v1911_v59  ;;  %v612_v50 = vpop.f32.mrf.mxu2  ;;  %v677_v54 = vpop.f32.mrf.mxu3  ;;  %1112 = vmatpush.xpose.msra.mxu2 %v351_v58 }
 0x10c   :  { %v613_v23 = vadd.f32 %v612_v50, %v548_v47  ;;  %v341_v47 = vld [vmem:[#allocation8 + $0x480] sm:$0xff]  ;;  %1049 = vmatpush.xpose.msra.mxu1 %v342_v48  ;;  %v448_v48 = vld [vmem:[#allocation8 + $0x7d8] sm:$0xff] }
 0x10d   :  { %984 = vmatpush.xpose.msra.mxu0 %v341_v47  ;;  %v2415_v47 = vld [vmem:[#allocation15_spill] sm:$0xff] }
 0x10e   :  { %v678_v26 = vadd.f32 %v677_v54, %v613_v23  ;;  %v340_v54 = vld [vmem:[#allocation8 + $0x478] sm:$0xff] }
 0x10f   :  { %v485_v56 = vpop.f32.mrf.mxu0  ;;  %1180 = vmatpush.xpose.msra.mxu3 %v340_v54  ;;  %v446_v54 = vld [vmem:[#allocation8 + $0x7c8] sm:$0xff] }
 0x110   :  { %v550_v6 = vpop.f32.mrf.mxu1  ;;  %1509 = vst [vmem:[#allocation10 + $0x80] sm:$0xff] %v678_v26  ;;  %874 = vmatmul.f32.gmra.mxu2 %v1917_v0  ;;  %939 = vmatmul.f32.gmra.mxu3 %v1919_v1  ;;  %v338_v26 = vld [vmem:[#allocation8 + $0x468] sm:$0xff] }
 0x111   :  { %v551_v57 = vadd.f32 %v550_v6, %v485_v56  ;;  %985 = vmatpush.xpose.msra.mxu0 %v337_v28  ;;  %1050 = vmatpush.xpose.msra.mxu1 %v338_v26  ;;  %v2419_v26 = vld [vmem:[#allocation19_spill] sm:$0xff] }
 0x112   :  { %744 = vmatmul.f32.gmra.mxu0 %v1921_v2  ;;  %v347_v2 = vld [vmem:[#allocation8 + $0x4b0] sm:$0xff] }
 0x113   :  { %809 = vmatmul.f32.gmra.mxu1 %v1923_v3  ;;  %v615_v59 = vpop.f32.mrf.mxu2  ;;  %v680_v10 = vpop.f32.mrf.mxu3  ;;  %1113 = vmatpush.xpose.msra.mxu2 %v347_v2 }
 0x114   :  { %v616_v7 = vadd.f32 %v615_v59, %v551_v57  ;;  %v336_v57 = vld [vmem:[#allocation8 + $0x458] sm:$0xff]  ;;  %v333_v59 = vld [vmem:[#allocation8 + $0x440] sm:$0xff] }
 0x115   :  { %1181 = vmatpush.xpose.msra.mxu3 %v336_v57  ;;  %986 = vmatpush.xpose.msra.mxu0 %v333_v59 }
 0x116   :  { %v681_v12 = vadd.f32 %v680_v10, %v616_v7  ;;  %v334_v10 = vld [vmem:[#allocation8 + $0x448] sm:$0xff] }
 0x117   :  { %v488_v0 = vpop.f32.mrf.mxu0  ;;  %1051 = vmatpush.xpose.msra.mxu1 %v334_v10 }
 0x118   :  { %v553_v35 = vpop.f32.mrf.mxu1  ;;  %1513 = vst [vmem:[#allocation10 + $0xa0] sm:$0xff] %v681_v12  ;;  %877 = vmatmul.f32.gmra.mxu2 %v1929_v8  ;;  %942 = vmatmul.f32.gmra.mxu3 %v1931_v9 }
 0x119   :  { %v554_v1 = vadd.f32 %v553_v35, %v488_v0  ;;  %1182 = vmatpush.xpose.msra.mxu3 %v332_v34  ;;  %v329_v35 = vld [vmem:[#allocation8 + $0x420] sm:$0xff]  ;;  %v440_v34 = vld [vmem:[#allocation8 + $0x798] sm:$0xff] }
 0x11a   :  { %747 = vmatmul.f32.gmra.mxu0 %v1933_v13  ;;  %v343_v13 = vld [vmem:[#allocation8 + $0x490] sm:$0xff] }
 0x11b   :  { %812 = vmatmul.f32.gmra.mxu1 %v1935_v15  ;;  %v618_v3 = vpop.f32.mrf.mxu2  ;;  %v683_v31 = vpop.f32.mrf.mxu3  ;;  %1114 = vmatpush.xpose.msra.mxu2 %v343_v13 }
 0x11c   :  { %v619_v38 = vadd.f32 %v618_v3, %v554_v1  ;;  %v330_v1 = vld [vmem:[#allocation8 + $0x428] sm:$0xff]  ;;  %987 = vmatpush.xpose.msra.mxu0 %v329_v35  ;;  %v328_v3 = vld [vmem:[#allocation8 + $0x418] sm:$0xff] }
 0x11d   :  { %1052 = vmatpush.xpose.msra.mxu1 %v330_v1  ;;  %1183 = vmatpush.xpose.msra.mxu3 %v328_v3  ;;  %v2113_v3 = vld [vmem:[#allocation2 + $0x10] sm:$0xff] }
 0x11e   :  { %v684_v30 = vadd.f32 %v683_v31, %v619_v38 }
 0x11f   :  { %v491_v8 = vpop.f32.mrf.mxu0 }
 0x120   :  { %v556_v52 = vpop.f32.mrf.mxu1  ;;  %1517 = vst [vmem:[#allocation10 + $0xc0] sm:$0xff] %v684_v30  ;;  %880 = vmatmul.f32.gmra.mxu2 %v1941_v20  ;;  %945 = vmatmul.f32.gmra.mxu3 %v1943_v21 }
 0x121   :  { %v557_v9 = vadd.f32 %v556_v52, %v491_v8  ;;  %988 = vmatpush.xpose.msra.mxu0 %v325_v14  ;;  %1053 = vmatpush.xpose.msra.mxu1 %v326_v53  ;;  %v452_v52 = vld [vmem:[#allocation8 + $0x7f8] sm:$0xff]  ;;  %v2119_v53 = vld [vmem:[#allocation2] sm:$0xff] }
 0x122   :  { %750 = vmatmul.f32.gmra.mxu0 %v1945_v25  ;;  %v339_v25 = vld [vmem:[#allocation8 + $0x470] sm:$0xff]  ;;  %1428 = vmatpush.xpose.msrb.mxu3 %v452_v52  ;;  %v436_v14 = vld [vmem:[#allocation8 + $0x778] sm:$0xff]  ;;  %v434_v52 = vld [vmem:[#allocation8 + $0x768] sm:$0xff] }
 0x123   :  { %815 = vmatmul.f32.gmra.mxu1 %v1947_v27  ;;  %v621_v15 = vpop.f32.mrf.mxu2  ;;  %v686_v46 = vpop.f32.mrf.mxu3  ;;  %1115 = vmatpush.xpose.msra.mxu2 %v339_v25  ;;  %v445_v25 = vld [vmem:[#allocation8 + $0x7c0] sm:$0xff] }
 0x124   :  { %v622_v5 = vadd.f32 %v621_v15, %v557_v9  ;;  %v450_v15 = vld [vmem:[#allocation8 + $0x7e8] sm:$0xff] }
 0x125   :  { %1233 = vmatpush.xpose.msrb.mxu0 %v449_v29  ;;  %1298 = vmatpush.xpose.msrb.mxu1 %v450_v15  ;;  %v2125_v29 = vld [vmem:[#allocation2 + $0x30] sm:$0xff] }
 0x126   :  { %v687_v22 = vadd.f32 %v686_v46, %v622_v5  ;;  %1429 = vmatpush.xpose.msrb.mxu3 %v448_v48 }
 0x127   :  { %v494_v20 = vpop.f32.mrf.mxu0 }
 0x128   :  { %v559_v50 = vpop.f32.mrf.mxu1  ;;  %1521 = vst [vmem:[#allocation10 + $0xe0] sm:$0xff] %v687_v22  ;;  %883 = vmatmul.f32.gmra.mxu2 %v1953_v32  ;;  %948 = vmatmul.f32.gmra.mxu3 %v1955_v33  ;;  %v2417_v22 = vld [vmem:[#allocation17_spill] sm:$0xff] }
 0x129   :  { %v560_v21 = vadd.f32 %v559_v50, %v494_v20  ;;  %1234 = vmatpush.xpose.msrb.mxu0 %v445_v25  ;;  %1299 = vmatpush.xpose.msrb.mxu1 %v446_v54  ;;  %v2137_v54 = vld [vmem:[#allocation2 + $0x50] sm:$0xff] }
 0x12a   :  { %753 = vmatmul.f32.gmra.mxu0 %v1957_v37  ;;  %v335_v37 = vld [vmem:[#allocation8 + $0x450] sm:$0xff] }
 0x12b   :  { %818 = vmatmul.f32.gmra.mxu1 %v1959_v39  ;;  %v624_v27 = vpop.f32.mrf.mxu2  ;;  %v689_v23 = vpop.f32.mrf.mxu3  ;;  %1116 = vmatpush.xpose.msra.mxu2 %v335_v37 }
 0x12c   :  { %v625_v24 = vadd.f32 %v624_v27, %v560_v21 }
 0x12e   :  { %v690_v56 = vadd.f32 %v689_v23, %v625_v24  ;;  %v2418_v24 = vld [vmem:[#allocation18_spill] sm:$0xff] }
 0x12f   :  { %v497_v32 = vpop.f32.mrf.mxu0 }
 0x130   :  { %v562_v6 = vpop.f32.mrf.mxu1  ;;  %1525 = vst [vmem:[#allocation10 + $0x100] sm:$0xff] %v690_v56  ;;  %886 = vmatmul.f32.gmra.mxu2 %v1965_v44  ;;  %951 = vmatmul.f32.gmra.mxu3 %v1967_v45  ;;  %v443_v56 = vld [vmem:[#allocation8 + $0x7b0] sm:$0xff] }
 0x131   :  { %v563_v33 = vadd.f32 %v562_v6, %v497_v32  ;;  %v444_v32 = vld [vmem:[#allocation8 + $0x7b8] sm:$0xff]  ;;  %v2420_v6 = vld [vmem:[#allocation20_spill] sm:$0xff] }
 0x132   :  { %756 = vmatmul.f32.gmra.mxu0 %v1969_v49  ;;  %v331_v49 = vld [vmem:[#allocation8 + $0x430] sm:$0xff]  ;;  %1430 = vmatpush.xpose.msrb.mxu3 %v444_v32 }
 0x133   :  { %821 = vmatmul.f32.gmra.mxu1 %v1971_v51  ;;  %v627_v39 = vpop.f32.mrf.mxu2  ;;  %v692_v58 = vpop.f32.mrf.mxu3  ;;  %1117 = vmatpush.xpose.msra.mxu2 %v331_v49  ;;  %v439_v49 = vld [vmem:[#allocation8 + $0x790] sm:$0xff] }
 0x134   :  { %v628_v55 = vadd.f32 %v627_v39, %v563_v33  ;;  %v2421_v33 = vld [vmem:[#allocation21_spill] sm:$0xff] }
 0x136   :  { %v693_v7 = vadd.f32 %v692_v58, %v628_v55  ;;  %v441_v58 = vld [vmem:[#allocation8 + $0x7a0] sm:$0xff]  ;;  %v442_v55 = vld [vmem:[#allocation8 + $0x7a8] sm:$0xff]  ;;  %1431 = vmatpush.xpose.msrb.mxu3 %v440_v34 }
 0x137   :  { %v500_v44 = vpop.f32.mrf.mxu0  ;;  %1235 = vmatpush.xpose.msrb.mxu0 %v441_v58  ;;  %1300 = vmatpush.xpose.msrb.mxu1 %v442_v55  ;;  %v2149_v55 = vld [vmem:[#allocation2 + $0x70] sm:$0xff] }
 0x138   :  { %v565_v11 = vpop.f32.mrf.mxu1  ;;  %1529 = vst [vmem:[#allocation10 + $0x120] sm:$0xff] %v693_v7  ;;  %889 = vmatmul.f32.gmra.mxu2 %v1977_v60  ;;  %954 = vmatmul.f32.gmra.mxu3 %v1979_v61 }
 0x139   :  { %v566_v45 = vadd.f32 %v565_v11, %v500_v44  ;;  %v2422_v44 = vld [vmem:[#allocation22_spill] sm:$0xff] }
 0x13a   :  { %759 = vmatmul.f32.gmra.mxu0 %v1981_v62  ;;  %v327_v62 = vld [vmem:[#allocation8 + $0x410] sm:$0xff]  ;;  %1432 = vmatpush.xpose.msrb.mxu3 %v436_v14  ;;  %v2170_v14 = vld [vmem:[#allocation2 + $0x88] sm:$0xff] }
 0x13b   :  { %824 = vmatmul.f32.gmra.mxu1 %v1983_v63  ;;  %v630_v51 = vpop.f32.mrf.mxu2  ;;  %v695_v12 = vpop.f32.mrf.mxu3  ;;  %1118 = vmatpush.xpose.msra.mxu2 %v327_v62 }
 0x13c   :  { %v631_v0 = vadd.f32 %v630_v51, %v566_v45  ;;  %v2423_v45 = vld [vmem:[#allocation23_spill] sm:$0xff]  ;;  %v2424_v51 = vld [vmem:[#allocation24_spill] sm:$0xff] }
 0x13e   :  { %v696_v2 = vadd.f32 %v695_v12, %v631_v0  ;;  %v2425_v12 = vld [vmem:[#allocation25_spill] sm:$0xff] }
 0x13f   :  { %v503_v60 = vpop.f32.mrf.mxu0 }
 0x140   :  { %v568_v36 = vpop.f32.mrf.mxu1  ;;  %1533 = vst [vmem:[#allocation10 + $0x140] sm:$0xff] %v696_v2  ;;  %892 = vmatmul.f32.gmra.mxu2 %v1989_v16  ;;  %957 = vmatmul.f32.gmra.mxu3 %v1991_v17  ;;  %v437_v2 = vld [vmem:[#allocation8 + $0x780] sm:$0xff] }
 0x141   :  { %v569_v61 = vadd.f32 %v568_v36, %v503_v60  ;;  %v438_v60 = vld [vmem:[#allocation8 + $0x788] sm:$0xff]  ;;  %1236 = vmatpush.xpose.msrb.mxu0 %v437_v2 }
 0x142   :  { %762 = vmatmul.f32.gmra.mxu0 %v1993_v18  ;;  %v451_v18 = vld [vmem:[#allocation8 + $0x7f0] sm:$0xff]  ;;  %1301 = vmatpush.xpose.msrb.mxu1 %v438_v60 }
 0x143   :  { %827 = vmatmul.f32.gmra.mxu1 %v1995_v19  ;;  %v633_v63 = vpop.f32.mrf.mxu2  ;;  %v698_v31 = vpop.f32.mrf.mxu3  ;;  %1363 = vmatpush.xpose.msrb.mxu2 %v451_v18  ;;  %v433_v18 = vld [vmem:[#allocation8 + $0x760] sm:$0xff]  ;;  %v2161_v60 = vld [vmem:[#allocation2 + $0x90] sm:$0xff] }
 0x144   :  { %v634_v38 = vadd.f32 %v633_v63, %v569_v61 }
 0x145   :  { %1237 = vmatpush.xpose.msrb.mxu0 %v433_v18  ;;  %v417_v18 = vld [vmem:[#allocation8 + $0x6e0] sm:$0xff] }
 0x146   :  { %v699_v30 = vadd.f32 %v698_v31, %v634_v38  ;;  %v2116_v31 = vld [vmem:[#allocation2 + $0x18] sm:$0xff]  ;;  %v435_v38 = vld [vmem:[#allocation8 + $0x770] sm:$0xff]  ;;  %1302 = vmatpush.xpose.msrb.mxu1 %v434_v52  ;;  %v418_v52 = vld [vmem:[#allocation8 + $0x6e8] sm:$0xff] }
 0x147   :  { %v506_v16 = vpop.f32.mrf.mxu0 }
 0x148   :  { %v571_v8 = vpop.f32.mrf.mxu1  ;;  %1537 = vst [vmem:[#allocation10 + $0x160] sm:$0xff] %v699_v30  ;;  %895 = vmatmul.f32.gmra.mxu2 %v2001_v40  ;;  %960 = vmatmul.f32.gmra.mxu3 %v2003_v41  ;;  %v2122_v30 = vld [vmem:[#allocation2 + $0x8] sm:$0xff] }
 0x149   :  { %v572_v17 = vadd.f32 %v571_v8, %v506_v16 }
 0x14a   :  { %765 = vmatmul.f32.gmra.mxu0 %v2005_v42  ;;  %v447_v42 = vld [vmem:[#allocation8 + $0x7d0] sm:$0xff] }
 0x14b   :  { %830 = vmatmul.f32.gmra.mxu1 %v2007_v43  ;;  %v636_v19 = vpop.f32.mrf.mxu2  ;;  %v701_v9 = vpop.f32.mrf.mxu3  ;;  %v2416_v43 = vld [vmem:[#allocation16_spill] sm:$0xff]  ;;  %1364 = vmatpush.xpose.msrb.mxu2 %v447_v42 }
 0x14c   :  { %v637_v13 = vadd.f32 %v636_v19, %v572_v17 }
 0x14e   :  { %v702_v46 = vadd.f32 %v701_v9, %v637_v13 }
 0x14f   :  { %v509_v40 = vpop.f32.mrf.mxu0  ;;  %1365 = vmatpush.xpose.msrb.mxu2 %v443_v56 }
 0x150   :  { %v574_v5 = vpop.f32.mrf.mxu1  ;;  %1541 = vst [vmem:[#allocation10 + $0x180] sm:$0xff] %v702_v46  ;;  %898 = vmatmul.f32.gmra.mxu2 %v2013_v4  ;;  %963 = vmatmul.f32.gmra.mxu3 %v2415_v47  ;;  %v2128_v46 = vld [vmem:[#allocation2 + $0x38] sm:$0xff]  ;;  %v2134_v47 = vld [vmem:[#allocation2 + $0x28] sm:$0xff] }
 0x151   :  { %v575_v41 = vadd.f32 %v574_v5, %v509_v40  ;;  %v431_v40 = vld [vmem:[#allocation8 + $0x750] sm:$0xff]  ;;  %v432_v5 = vld [vmem:[#allocation8 + $0x758] sm:$0xff] }
 0x152   :  { %768 = vmatmul.f32.gmra.mxu0 %v2416_v43  ;;  %1433 = vmatpush.xpose.msrb.mxu3 %v432_v5  ;;  %v2176_v5 = vld [vmem:[#allocation2 + $0xb8] sm:$0xff] }
 0x153   :  { %833 = vmatmul.f32.gmra.mxu1 %v2417_v22  ;;  %v639_v20 = vpop.f32.mrf.mxu2  ;;  %v704_v50 = vpop.f32.mrf.mxu3  ;;  %1366 = vmatpush.xpose.msrb.mxu2 %v439_v49  ;;  %v429_v22 = vld [vmem:[#allocation8 + $0x740] sm:$0xff] }
 0x154   :  { %v640_v21 = vadd.f32 %v639_v20, %v575_v41  ;;  %v2131_v41 = vld [vmem:[#allocation2 + $0x20] sm:$0xff]  ;;  %v430_v20 = vld [vmem:[#allocation8 + $0x748] sm:$0xff]  ;;  %1238 = vmatpush.xpose.msrb.mxu0 %v429_v22 }
 0x155   :  { %1303 = vmatpush.xpose.msrb.mxu1 %v430_v20  ;;  %v2182_v22 = vld [vmem:[#allocation2 + $0xa8] sm:$0xff] }
 0x156   :  { %v705_v27 = vadd.f32 %v704_v50, %v640_v21 }
 0x157   :  { %v512_v4 = vpop.f32.mrf.mxu0  ;;  %1367 = vmatpush.xpose.msrb.mxu2 %v435_v38  ;;  %v2167_v38 = vld [vmem:[#allocation2 + $0x80] sm:$0xff] }
 0x158   :  { %v577_v23 = vpop.f32.mrf.mxu1  ;;  %1545 = vst [vmem:[#allocation10 + $0x1a0] sm:$0xff] %v705_v27  ;;  %901 = vmatmul.f32.gmra.mxu2 %v2418_v24  ;;  %966 = vmatmul.f32.gmra.mxu3 %v2419_v26  ;;  %v428_v24 = vld [vmem:[#allocation8 + $0x738] sm:$0xff]  ;;  %v2146_v26 = vld [vmem:[#allocation2 + $0x48] sm:$0xff] }
 0x159   :  { %v578_v28 = vadd.f32 %v577_v23, %v512_v4  ;;  %v2140_v4 = vld [vmem:[#allocation2 + $0x58] sm:$0xff]  ;;  %v427_v23 = vld [vmem:[#allocation8 + $0x730] sm:$0xff]  ;;  %1434 = vmatpush.xpose.msrb.mxu3 %v428_v24 }
 0x15a   :  { %771 = vmatmul.f32.gmra.mxu0 %v2420_v6 }
 0x15b   :  { %836 = vmatmul.f32.gmra.mxu1 %v2421_v33  ;;  %v642_v37 = vpop.f32.mrf.mxu2  ;;  %v707_v57 = vpop.f32.mrf.mxu3  ;;  %1368 = vmatpush.xpose.msrb.mxu2 %v431_v40  ;;  %v425_v33 = vld [vmem:[#allocation8 + $0x720] sm:$0xff] }
 0x15c   :  { %v643_v39 = vadd.f32 %v642_v37, %v578_v28  ;;  %v2143_v28 = vld [vmem:[#allocation2 + $0x40] sm:$0xff]  ;;  %v426_v37 = vld [vmem:[#allocation8 + $0x728] sm:$0xff]  ;;  %1239 = vmatpush.xpose.msrb.mxu0 %v425_v33  ;;  %v2188_v33 = vld [vmem:[#allocation2 + $0xd8] sm:$0xff] }
 0x15d   :  { %1304 = vmatpush.xpose.msrb.mxu1 %v426_v37  ;;  %v411_v37 = vld [vmem:[#allocation8 + $0x6b0] sm:$0xff] }
 0x15e   :  { %v708_v59 = vadd.f32 %v707_v57, %v643_v39 }
 0x15f   :  { %v515_v10 = vpop.f32.mrf.mxu0  ;;  %1369 = vmatpush.xpose.msrb.mxu2 %v427_v23 }
 0x160   :  { %v580_v7 = vpop.f32.mrf.mxu1  ;;  %1549 = vst [vmem:[#allocation10 + $0x1c0] sm:$0xff] %v708_v59  ;;  %904 = vmatmul.f32.gmra.mxu2 %v2422_v44  ;;  %969 = vmatmul.f32.gmra.mxu3 %v2423_v45  ;;  %v424_v44 = vld [vmem:[#allocation8 + $0x718] sm:$0xff]  ;;  %v2158_v45 = vld [vmem:[#allocation2 + $0x68] sm:$0xff] }
 0x161   :  { %v581_v11 = vadd.f32 %v580_v7, %v515_v10  ;;  %v2152_v10 = vld [vmem:[#allocation2 + $0x78] sm:$0xff]  ;;  %v423_v7 = vld [vmem:[#allocation8 + $0x710] sm:$0xff]  ;;  %1435 = vmatpush.xpose.msrb.mxu3 %v424_v44 }
 0x162   :  { %774 = vmatmul.f32.gmra.mxu0 %v2424_v51 }
 0x163   :  { %839 = vmatmul.f32.gmra.mxu1 %v2425_v12  ;;  %v645_v0 = vpop.f32.mrf.mxu2  ;;  %v710_v35 = vpop.f32.mrf.mxu3  ;;  %1370 = vmatpush.xpose.msrb.mxu2 %v423_v7  ;;  %v421_v12 = vld [vmem:[#allocation8 + $0x700] sm:$0xff] }
 0x164   :  { %v646_v1 = vadd.f32 %v645_v0, %v581_v11  ;;  %v2155_v11 = vld [vmem:[#allocation2 + $0x60] sm:$0xff]  ;;  %v422_v0 = vld [vmem:[#allocation8 + $0x708] sm:$0xff]  ;;  %1240 = vmatpush.xpose.msrb.mxu0 %v421_v12 }
 0x165   :  { %1305 = vmatpush.xpose.msrb.mxu1 %v422_v0 }
 0x166   :  { %v711_v36 = vadd.f32 %v710_v35, %v646_v1 }
 0x167   :  { %v730_v61 = vpop.f32.mrf.mxu0 }
 0x168   :  { %v795_v62 = vpop.f32.mrf.mxu1  ;;  %1553 = vst [vmem:[#allocation10 + $0x1e0] sm:$0xff] %v711_v36  ;;  %1119 = vmatmul.f32.vlgmr.msra.gmra.mxu2 %v2113_v3  ;;  %1184 = vmatmul.f32.vlgmr.msra.gmra.mxu3 %v2116_v31 }
 0x169   :  { %v796_v63 = vadd.f32 %v795_v62, %v730_v61  ;;  %v2164_v61 = vld [vmem:[#allocation2 + $0x98] sm:$0xff]  ;;  %v419_v62 = vld [vmem:[#allocation8 + $0x6f0] sm:$0xff]  ;;  %1241 = vmatpush.xpose.msrb.mxu0 %v417_v18  ;;  %1306 = vmatpush.xpose.msrb.mxu1 %v418_v52  ;;  %v405_v52 = vld [vmem:[#allocation8 + $0x680] sm:$0xff] }
 0x16a   :  { %989 = vmatmul.f32.vlgmr.msra.gmra.mxu0 %v2119_v53  ;;  %1371 = vmatpush.xpose.msrb.mxu2 %v419_v62  ;;  %v408_v62 = vld [vmem:[#allocation8 + $0x698] sm:$0xff] }
 0x16b   :  { %1054 = vmatmul.f32.vlgmr.msra.gmra.mxu1 %v2122_v30  ;;  %v860_v16 = vpop.f32.mrf.mxu2  ;;  %v925_v8 = vpop.f32.mrf.mxu3 }
 0x16c   :  { %v861_v17 = vadd.f32 %v860_v16, %v796_v63  ;;  %v420_v63 = vld [vmem:[#allocation8 + $0x6f8] sm:$0xff] }
 0x16d   :  { %1436 = vmatpush.xpose.msrb.mxu3 %v420_v63  ;;  %v2203_v63 = vld [vmem:[#allocation2 + $0xe0] sm:$0xff] }
 0x16e   :  { %v926_v19 = vadd.f32 %v925_v8, %v861_v17 }
 0x16f   :  { %v733_v9 = vpop.f32.mrf.mxu0 }
 0x170   :  { %v798_v13 = vpop.f32.mrf.mxu1  ;;  %1494 = vst [vmem:[#allocation10 + $0x8] sm:$0xff] %v926_v19  ;;  %1122 = vmatmul.f32.gmra.mxu2 %v2125_v29  ;;  %1187 = vmatmul.f32.gmra.mxu3 %v2128_v46 }
 0x171   :  { %v799_v15 = vadd.f32 %v798_v13, %v733_v9 }
 0x172   :  { %992 = vmatmul.f32.gmra.mxu0 %v2131_v41 }
 0x173   :  { %1057 = vmatmul.f32.gmra.mxu1 %v2134_v47  ;;  %v863_v42 = vpop.f32.mrf.mxu2  ;;  %v928_v48 = vpop.f32.mrf.mxu3 }
 0x174   :  { %v864_v43 = vadd.f32 %v863_v42, %v799_v15  ;;  %v2173_v15 = vld [vmem:[#allocation2 + $0xb0] sm:$0xff] }
 0x175   :  { %v415_v42 = vld [vmem:[#allocation8 + $0x6d0] sm:$0xff] }
 0x176   :  { %v929_v50 = vadd.f32 %v928_v48, %v864_v43  ;;  %v416_v48 = vld [vmem:[#allocation8 + $0x6d8] sm:$0xff]  ;;  %v2179_v43 = vld [vmem:[#allocation2 + $0xa0] sm:$0xff]  ;;  %1372 = vmatpush.xpose.msrb.mxu2 %v415_v42  ;;  %v2209_v42 = vld [vmem:[#allocation2 + $0x110] sm:$0xff] }
 0x177   :  { %v736_v21 = vpop.f32.mrf.mxu0  ;;  %1437 = vmatpush.xpose.msrb.mxu3 %v416_v48 }
 0x178   :  { %v801_v25 = vpop.f32.mrf.mxu1  ;;  %1498 = vst [vmem:[#allocation10 + $0x28] sm:$0xff] %v929_v50  ;;  %1125 = vmatmul.f32.gmra.mxu2 %v2137_v54  ;;  %1190 = vmatmul.f32.gmra.mxu3 %v2140_v4 }
 0x179   :  { %v802_v27 = vadd.f32 %v801_v25, %v736_v21  ;;  %v413_v25 = vld [vmem:[#allocation8 + $0x6c0] sm:$0xff] }
 0x17a   :  { %995 = vmatmul.f32.gmra.mxu0 %v2143_v28  ;;  %1373 = vmatpush.xpose.msrb.mxu2 %v411_v37  ;;  %v402_v37 = vld [vmem:[#allocation8 + $0x668] sm:$0xff] }
 0x17b   :  { %1060 = vmatmul.f32.gmra.mxu1 %v2146_v26  ;;  %v866_v56 = vpop.f32.mrf.mxu2  ;;  %v931_v32 = vpop.f32.mrf.mxu3  ;;  %1242 = vmatpush.xpose.msrb.mxu0 %v413_v25  ;;  %v2215_v25 = vld [vmem:[#allocation2 + $0x100] sm:$0xff] }
 0x17c   :  { %v867_v6 = vadd.f32 %v866_v56, %v802_v27  ;;  %v414_v27 = vld [vmem:[#allocation8 + $0x6c8] sm:$0xff] }
 0x17d   :  { %1307 = vmatpush.xpose.msrb.mxu1 %v414_v27  ;;  %v2218_v27 = vld [vmem:[#allocation2 + $0x108] sm:$0xff] }
 0x17e   :  { %v932_v57 = vadd.f32 %v931_v32, %v867_v6  ;;  %v2185_v32 = vld [vmem:[#allocation2 + $0xd0] sm:$0xff] }
 0x17f   :  { %v739_v39 = vpop.f32.mrf.mxu0 }
 0x180   :  { %v804_v58 = vpop.f32.mrf.mxu1  ;;  %1502 = vst [vmem:[#allocation10 + $0x48] sm:$0xff] %v932_v57  ;;  %1128 = vmatmul.f32.gmra.mxu2 %v2149_v55  ;;  %1193 = vmatmul.f32.gmra.mxu3 %v2152_v10  ;;  %v412_v57 = vld [vmem:[#allocation8 + $0x6b8] sm:$0xff] }
 0x181   :  { %v805_v59 = vadd.f32 %v804_v58, %v739_v39  ;;  %v2191_v39 = vld [vmem:[#allocation2 + $0xc0] sm:$0xff]  ;;  %v2194_v58 = vld [vmem:[#allocation2 + $0xc8] sm:$0xff]  ;;  %1438 = vmatpush.xpose.msrb.mxu3 %v412_v57 }
 0x182   :  { %998 = vmatmul.f32.gmra.mxu0 %v2155_v11 }
 0x183   :  { %1063 = vmatmul.f32.gmra.mxu1 %v2158_v45  ;;  %v869_v49 = vpop.f32.mrf.mxu2  ;;  %v934_v34 = vpop.f32.mrf.mxu3 }
 0x184   :  { %v870_v51 = vadd.f32 %v869_v49, %v805_v59  ;;  %v409_v49 = vld [vmem:[#allocation8 + $0x6a0] sm:$0xff] }
 0x185   :  { %1243 = vmatpush.xpose.msrb.mxu0 %v409_v49  ;;  %1439 = vmatpush.xpose.msrb.mxu3 %v408_v62 }
 0x186   :  { %v935_v35 = vadd.f32 %v934_v34, %v870_v51  ;;  %v410_v34 = vld [vmem:[#allocation8 + $0x6a8] sm:$0xff] }
 0x187   :  { %v742_v1 = vpop.f32.mrf.mxu0  ;;  %1308 = vmatpush.xpose.msrb.mxu1 %v410_v34  ;;  %v2224_v34 = vld [vmem:[#allocation2 + $0x138] sm:$0xff] }
 0x188   :  { %v807_v2 = vpop.f32.mrf.mxu1  ;;  %1506 = vst [vmem:[#allocation10 + $0x68] sm:$0xff] %v935_v35  ;;  %1131 = vmatmul.f32.gmra.mxu2 %v2161_v60  ;;  %1196 = vmatmul.f32.gmra.mxu3 %v2164_v61  ;;  %v2197_v35 = vld [vmem:[#allocation2 + $0xf0] sm:$0xff] }
 0x189   :  { %v808_v36 = vadd.f32 %v807_v2, %v742_v1  ;;  %v2200_v2 = vld [vmem:[#allocation2 + $0xf8] sm:$0xff]  ;;  %1244 = vmatpush.xpose.msrb.mxu0 %v405_v52 }
 0x18a   :  { %1001 = vmatmul.f32.gmra.mxu0 %v2167_v38 }
 0x18b   :  { %1066 = vmatmul.f32.gmra.mxu1 %v2170_v14  ;;  %v872_v16 = vpop.f32.mrf.mxu2  ;;  %v937_v8 = vpop.f32.mrf.mxu3 }
 0x18c   :  { %v873_v17 = vadd.f32 %v872_v16, %v808_v36  ;;  %v407_v36 = vld [vmem:[#allocation8 + $0x690] sm:$0xff]  ;;  %v2206_v16 = vld [vmem:[#allocation2 + $0xe8] sm:$0xff] }
 0x18d   :  { %1374 = vmatpush.xpose.msrb.mxu2 %v407_v36 }
 0x18e   :  { %v938_v19 = vadd.f32 %v937_v8, %v873_v17 }
 0x18f   :  { %v745_v9 = vpop.f32.mrf.mxu0 }
 0x190   :  { %v810_v13 = vpop.f32.mrf.mxu1  ;;  %1510 = vst [vmem:[#allocation10 + $0x88] sm:$0xff] %v938_v19  ;;  %1134 = vmatmul.f32.gmra.mxu2 %v2173_v15  ;;  %1199 = vmatmul.f32.gmra.mxu3 %v2176_v5  ;;  %v406_v19 = vld [vmem:[#allocation8 + $0x688] sm:$0xff] }
 0x191   :  { %v811_v40 = vadd.f32 %v810_v13, %v745_v9  ;;  %1309 = vmatpush.xpose.msrb.mxu1 %v406_v19 }
 0x192   :  { %1004 = vmatmul.f32.gmra.mxu0 %v2179_v43 }
 0x193   :  { %1069 = vmatmul.f32.gmra.mxu1 %v2182_v22  ;;  %v875_v20 = vpop.f32.mrf.mxu2  ;;  %v940_v50 = vpop.f32.mrf.mxu3 }
 0x194   :  { %v876_v21 = vadd.f32 %v875_v20, %v811_v40  ;;  %v2212_v20 = vld [vmem:[#allocation2 + $0x118] sm:$0xff] }
 0x195   :  { %1310 = vmatpush.xpose.msrb.mxu1 %v402_v37 }
 0x196   :  { %v941_v23 = vadd.f32 %v940_v50, %v876_v21  ;;  %v403_v50 = vld [vmem:[#allocation8 + $0x670] sm:$0xff]  ;;  %v404_v21 = vld [vmem:[#allocation8 + $0x678] sm:$0xff] }
 0x197   :  { %v748_v24 = vpop.f32.mrf.mxu0  ;;  %1375 = vmatpush.xpose.msrb.mxu2 %v403_v50  ;;  %1440 = vmatpush.xpose.msrb.mxu3 %v404_v21  ;;  %v395_v50 = vld [vmem:[#allocation8 + $0x630] sm:$0xff]  ;;  %v396_v21 = vld [vmem:[#allocation8 + $0x638] sm:$0xff] }
 0x198   :  { %v813_v56 = vpop.f32.mrf.mxu1  ;;  %1514 = vst [vmem:[#allocation10 + $0xa8] sm:$0xff] %v941_v23  ;;  %1137 = vmatmul.f32.gmra.mxu2 %v2185_v32  ;;  %1202 = vmatmul.f32.gmra.mxu3 %v2188_v33 }
 0x199   :  { %v814_v6 = vadd.f32 %v813_v56, %v748_v24 }
 0x19a   :  { %1007 = vmatmul.f32.gmra.mxu0 %v2191_v39 }
 0x19b   :  { %1072 = vmatmul.f32.gmra.mxu1 %v2194_v58  ;;  %v878_v59 = vpop.f32.mrf.mxu2  ;;  %v943_v7 = vpop.f32.mrf.mxu3 }
 0x19c   :  { %v879_v44 = vadd.f32 %v878_v59, %v814_v6  ;;  %v401_v6 = vld [vmem:[#allocation8 + $0x660] sm:$0xff] }
 0x19d   :  { %1245 = vmatpush.xpose.msrb.mxu0 %v401_v6 }
 0x19e   :  { %v944_v51 = vadd.f32 %v943_v7, %v879_v44  ;;  %v2221_v44 = vld [vmem:[#allocation2 + $0x130] sm:$0xff] }
 0x19f   :  { %v751_v12 = vpop.f32.mrf.mxu0 }
 0x1a0   :  { %v816_v0 = vpop.f32.mrf.mxu1  ;;  %1518 = vst [vmem:[#allocation10 + $0xc8] sm:$0xff] %v944_v51  ;;  %1140 = vmatmul.f32.gmra.mxu2 %v2197_v35  ;;  %1205 = vmatmul.f32.gmra.mxu3 %v2200_v2  ;;  %v399_v51 = vld [vmem:[#allocation8 + $0x650] sm:$0xff] }
 0x1a1   :  { %v817_v1 = vadd.f32 %v816_v0, %v751_v12  ;;  %v400_v12 = vld [vmem:[#allocation8 + $0x658] sm:$0xff]  ;;  %v2227_v0 = vld [vmem:[#allocation2 + $0x120] sm:$0xff]  ;;  %1376 = vmatpush.xpose.msrb.mxu2 %v399_v51 }
 0x1a2   :  { %1010 = vmatmul.f32.gmra.mxu0 %v2203_v63  ;;  %1441 = vmatpush.xpose.msrb.mxu3 %v400_v12  ;;  %v2245_v12 = vld [vmem:[#allocation2 + $0x170] sm:$0xff] }
 0x1a3   :  { %1075 = vmatmul.f32.gmra.mxu1 %v2206_v16  ;;  %v881_v8 = vpop.f32.mrf.mxu2  ;;  %v946_v17 = vpop.f32.mrf.mxu3 }
 0x1a4   :  { %v882_v18 = vadd.f32 %v881_v8, %v817_v1  ;;  %v2230_v1 = vld [vmem:[#allocation2 + $0x128] sm:$0xff] }
 0x1a5   :  { %1377 = vmatpush.xpose.msrb.mxu2 %v395_v50  ;;  %v389_v50 = vld [vmem:[#allocation8 + $0x600] sm:$0xff] }
 0x1a6   :  { %v947_v9 = vadd.f32 %v946_v17, %v882_v18  ;;  %v397_v17 = vld [vmem:[#allocation8 + $0x640] sm:$0xff]  ;;  %v398_v18 = vld [vmem:[#allocation8 + $0x648] sm:$0xff]  ;;  %1442 = vmatpush.xpose.msrb.mxu3 %v396_v21 }
 0x1a7   :  { %v754_v13 = vpop.f32.mrf.mxu0  ;;  %1246 = vmatpush.xpose.msrb.mxu0 %v397_v17  ;;  %1311 = vmatpush.xpose.msrb.mxu1 %v398_v18  ;;  %v392_v17 = vld [vmem:[#allocation8 + $0x618] sm:$0xff]  ;;  %v2251_v18 = vld [vmem:[#allocation2 + $0x160] sm:$0xff]  ;;  %v390_v21 = vld [vmem:[#allocation8 + $0x608] sm:$0xff] }
 0x1a8   :  { %v819_v40 = vpop.f32.mrf.mxu1  ;;  %1522 = vst [vmem:[#allocation10 + $0xe8] sm:$0xff] %v947_v9  ;;  %1143 = vmatmul.f32.gmra.mxu2 %v2209_v42  ;;  %1208 = vmatmul.f32.gmra.mxu3 %v2212_v20 }
 0x1a9   :  { %v820_v48 = vadd.f32 %v819_v40, %v754_v13  ;;  %v2233_v13 = vld [vmem:[#allocation2 + $0x150] sm:$0xff] }
 0x1aa   :  { %1013 = vmatmul.f32.gmra.mxu0 %v2215_v25  ;;  %1443 = vmatpush.xpose.msrb.mxu3 %v392_v17 }
 0x1ab   :  { %1078 = vmatmul.f32.gmra.mxu1 %v2218_v27  ;;  %v884_v23 = vpop.f32.mrf.mxu2  ;;  %v949_v24 = vpop.f32.mrf.mxu3 }
 0x1ac   :  { %v885_v56 = vadd.f32 %v884_v23, %v820_v48  ;;  %v2236_v48 = vld [vmem:[#allocation2 + $0x158] sm:$0xff]  ;;  %v2239_v23 = vld [vmem:[#allocation2 + $0x140] sm:$0xff] }
 0x1ae   :  { %v950_v57 = vadd.f32 %v949_v24, %v885_v56  ;;  %v2242_v24 = vld [vmem:[#allocation2 + $0x148] sm:$0xff] }
 0x1af   :  { %v757_v59 = vpop.f32.mrf.mxu0 }
 0x1b0   :  { %v822_v7 = vpop.f32.mrf.mxu1  ;;  %1526 = vst [vmem:[#allocation10 + $0x108] sm:$0xff] %v950_v57  ;;  %1146 = vmatmul.f32.gmra.mxu2 %v2221_v44  ;;  %1211 = vmatmul.f32.gmra.mxu3 %v2224_v34  ;;  %v393_v57 = vld [vmem:[#allocation8 + $0x620] sm:$0xff] }
 0x1b1   :  { %v823_v49 = vadd.f32 %v822_v7, %v757_v59  ;;  %v394_v59 = vld [vmem:[#allocation8 + $0x628] sm:$0xff]  ;;  %1247 = vmatpush.xpose.msrb.mxu0 %v393_v57  ;;  %v2257_v57 = vld [vmem:[#allocation2 + $0x190] sm:$0xff] }
 0x1b2   :  { %1016 = vmatmul.f32.gmra.mxu0 %v2227_v0  ;;  %1312 = vmatpush.xpose.msrb.mxu1 %v394_v59 }
 0x1b3   :  { %1081 = vmatmul.f32.gmra.mxu1 %v2230_v1  ;;  %v887_v36 = vpop.f32.mrf.mxu2  ;;  %v952_v62 = vpop.f32.mrf.mxu3 }
 0x1b4   :  { %v888_v8 = vadd.f32 %v887_v36, %v823_v49 }
 0x1b5   :  { %1248 = vmatpush.xpose.msrb.mxu0 %v389_v50  ;;  %v2269_v50 = vld [vmem:[#allocation2 + $0x1b0] sm:$0xff] }
 0x1b6   :  { %v953_v52 = vadd.f32 %v952_v62, %v888_v8  ;;  %v2248_v62 = vld [vmem:[#allocation2 + $0x178] sm:$0xff]  ;;  %v391_v8 = vld [vmem:[#allocation8 + $0x610] sm:$0xff]  ;;  %1313 = vmatpush.xpose.msrb.mxu1 %v390_v21  ;;  %2428 = vst [vmem:[#allocation17_spill] sm:$0xff] %v2269_v50 }
 0x1b7   :  { %v760_v19 = vpop.f32.mrf.mxu0  ;;  %1378 = vmatpush.xpose.msrb.mxu2 %v391_v8 }
 0x1b8   :  { %v825_v9 = vpop.f32.mrf.mxu1  ;;  %1530 = vst [vmem:[#allocation10 + $0x128] sm:$0xff] %v953_v52  ;;  %1149 = vmatmul.f32.gmra.mxu2 %v2233_v13  ;;  %1214 = vmatmul.f32.gmra.mxu3 %v2236_v48  ;;  %v2254_v52 = vld [vmem:[#allocation2 + $0x168] sm:$0xff] }
 0x1b9   :  { %v826_v40 = vadd.f32 %v825_v9, %v760_v19 }
 0x1ba   :  { %1019 = vmatmul.f32.gmra.mxu0 %v2239_v23 }
 0x1bb   :  { %1084 = vmatmul.f32.gmra.mxu1 %v2242_v24  ;;  %v890_v56 = vpop.f32.mrf.mxu2  ;;  %v955_v6 = vpop.f32.mrf.mxu3 }
 0x1bc   :  { %v891_v37 = vadd.f32 %v890_v56, %v826_v40 }
 0x1be   :  { %v956_v7 = vadd.f32 %v955_v6, %v891_v37 }
 0x1bf   :  { %v763_v49 = vpop.f32.mrf.mxu0 }
 0x1c0   :  { %v828_v51 = vpop.f32.mrf.mxu1  ;;  %1534 = vst [vmem:[#allocation10 + $0x148] sm:$0xff] %v956_v7  ;;  %1152 = vmatmul.f32.gmra.mxu2 %v2245_v12  ;;  %1217 = vmatmul.f32.gmra.mxu3 %v2248_v62  ;;  %v2260_v7 = vld [vmem:[#allocation2 + $0x198] sm:$0xff] }
 0x1c1   :  { %v829_v36 = vadd.f32 %v828_v51, %v763_v49  ;;  %v2263_v49 = vld [vmem:[#allocation2 + $0x180] sm:$0xff]  ;;  %v2266_v51 = vld [vmem:[#allocation2 + $0x188] sm:$0xff] }
 0x1c2   :  { %1022 = vmatmul.f32.gmra.mxu0 %v2251_v18  ;;  %2426 = vst [vmem:[#allocation15_spill] sm:$0xff] %v2263_v49 }
 0x1c3   :  { %1087 = vmatmul.f32.gmra.mxu1 %v2254_v52  ;;  %v893_v19 = vpop.f32.mrf.mxu2  ;;  %v958_v9 = vpop.f32.mrf.mxu3  ;;  %2427 = vst [vmem:[#allocation16_spill] sm:$0xff] %v2266_v51 }
 0x1c4   :  { %v894_v40 = vadd.f32 %v893_v19, %v829_v36 }
 0x1c6   :  { %v959_v56 = vadd.f32 %v958_v9, %v894_v40 }
 0x1c7   :  { %v766_v6 = vpop.f32.mrf.mxu0 }
 0x1c8   :  { %v831_v37 = vpop.f32.mrf.mxu1  ;;  %1538 = vst [vmem:[#allocation10 + $0x168] sm:$0xff] %v959_v56  ;;  %1155 = vmatmul.f32.gmra.mxu2 %v2257_v57  ;;  %1220 = vmatmul.f32.gmra.mxu3 %v2260_v7  ;;  %v2272_v56 = vld [vmem:[#allocation2 + $0x1b8] sm:$0xff] }
 0x1c9   :  { %v832_v59 = vadd.f32 %v831_v37, %v766_v6  ;;  %2429 = vst [vmem:[#allocation18_spill] sm:$0xff] %v2272_v56  ;;  %v2275_v6 = vld [vmem:[#allocation2 + $0x1a0] sm:$0xff]  ;;  %v2278_v37 = vld [vmem:[#allocation2 + $0x1a8] sm:$0xff] }
 0x1ca   :  { %1025 = vmatmul.f32.gmra.mxu0 %v2263_v49  ;;  %2430 = vst [vmem:[#allocation19_spill] sm:$0xff] %v2275_v6 }
 0x1cb   :  { %1090 = vmatmul.f32.gmra.mxu1 %v2266_v51  ;;  %v896_v36 = vpop.f32.mrf.mxu2  ;;  %v961_v8 = vpop.f32.mrf.mxu3  ;;  %2431 = vst [vmem:[#allocation20_spill] sm:$0xff] %v2278_v37 }
 0x1cc   :  { %v897_v17 = vadd.f32 %v896_v36, %v832_v59 }
 0x1ce   :  { %v962_v19 = vadd.f32 %v961_v8, %v897_v17 }
 0x1cf   :  { %v769_v9 = vpop.f32.mrf.mxu0 }
 0x1d0   :  { %v834_v40 = vpop.f32.mrf.mxu1  ;;  %1542 = vst [vmem:[#allocation10 + $0x188] sm:$0xff] %v962_v19  ;;  %1158 = vmatmul.f32.gmra.mxu2 %v2269_v50  ;;  %1223 = vmatmul.f32.gmra.mxu3 %v2272_v56  ;;  %v2284_v56 = vld [vmem:[#allocation2 + $0x1d8] sm:$0xff] }
 0x1d1   :  { %v835_v21 = vadd.f32 %v834_v40, %v769_v9  ;;  %v2281_v9 = vld [vmem:[#allocation2 + $0x1d0] sm:$0xff]  ;;  %2433 = vst [vmem:[#allocation22_spill] sm:$0xff] %v2284_v56 }
 0x1d2   :  { %1028 = vmatmul.f32.gmra.mxu0 %v2275_v6  ;;  %2432 = vst [vmem:[#allocation21_spill] sm:$0xff] %v2281_v9  ;;  %v2287_v6 = vld [vmem:[#allocation2 + $0x1c0] sm:$0xff] }
 0x1d3   :  { %1093 = vmatmul.f32.gmra.mxu1 %v2278_v37  ;;  %v899_v59 = vpop.f32.mrf.mxu2  ;;  %v964_v36 = vpop.f32.mrf.mxu3  ;;  %2434 = vst [vmem:[#allocation23_spill] sm:$0xff] %v2287_v6  ;;  %v2290_v37 = vld [vmem:[#allocation2 + $0x1c8] sm:$0xff] }
 0x1d4   :  { %v900_v8 = vadd.f32 %v899_v59, %v835_v21  ;;  %2435 = vst [vmem:[#allocation24_spill] sm:$0xff] %v2290_v37 }
 0x1d6   :  { %v965_v17 = vadd.f32 %v964_v36, %v900_v8 }
 0x1d7   :  { %v772_v19 = vpop.f32.mrf.mxu0 }
 0x1d8   :  { %v837_v51 = vpop.f32.mrf.mxu1  ;;  %1546 = vst [vmem:[#allocation10 + $0x1a8] sm:$0xff] %v965_v17  ;;  %1161 = vmatmul.f32.gmra.mxu2 %v2281_v9  ;;  %1226 = vmatmul.f32.gmra.mxu3 %v2284_v56  ;;  %v2296_v56 = vld [vmem:[#allocation2 + $0x1f8] sm:$0xff] }
 0x1d9   :  { %v838_v40 = vadd.f32 %v837_v51, %v772_v19  ;;  %v2293_v51 = vld [vmem:[#allocation2 + $0x1f0] sm:$0xff]  ;;  %2437 = vst [vmem:[#allocation26_spill] sm:$0xff] %v2296_v56 }
 0x1da   :  { %1031 = vmatmul.f32.gmra.mxu0 %v2287_v6  ;;  %2436 = vst [vmem:[#allocation25_spill] sm:$0xff] %v2293_v51  ;;  %v2299_v6 = vld [vmem:[#allocation2 + $0x1e0] sm:$0xff] }
 0x1db   :  { %1096 = vmatmul.f32.gmra.mxu1 %v2290_v37  ;;  %v902_v21 = vpop.f32.mrf.mxu2  ;;  %v967_v59 = vpop.f32.mrf.mxu3  ;;  %2438 = vst [vmem:[#allocation27_spill] sm:$0xff] %v2299_v6  ;;  %v2302_v37 = vld [vmem:[#allocation2 + $0x1e8] sm:$0xff] }
 0x1dc   :  { %v903_v36 = vadd.f32 %v902_v21, %v838_v40  ;;  %2439 = vst [vmem:[#allocation28_spill] sm:$0xff] %v2302_v37 }
 0x1de   :  { %v968_v8 = vadd.f32 %v967_v59, %v903_v36 }
 0x1df   :  { %v775_v17 = vpop.f32.mrf.mxu0 }
 0x1e0   :  { %v840_v50 = vpop.f32.mrf.mxu1  ;;  %1550 = vst [vmem:[#allocation10 + $0x1c8] sm:$0xff] %v968_v8  ;;  %1164 = vmatmul.f32.gmra.mxu2 %v2293_v51  ;;  %1229 = vmatmul.f32.gmra.mxu3 %v2296_v56 }
 0x1e1   :  { %v841_v19 = vadd.f32 %v840_v50, %v775_v17 }
 0x1e2   :  { %1034 = vmatmul.f32.gmra.mxu0 %v2299_v6 }
 0x1e3   :  { %1099 = vmatmul.f32.gmra.mxu1 %v2302_v37  ;;  %v905_v40 = vpop.f32.mrf.mxu2  ;;  %v970_v21 = vpop.f32.mrf.mxu3 }
 0x1e4   :  { %v906_v59 = vadd.f32 %v905_v40, %v841_v19 }
 0x1e6   :  { %v971_v36 = vadd.f32 %v970_v21, %v906_v59 }
 0x1e7   :  { %v990_v8 = vpop.f32.mrf.mxu0 }
 0x1e8   :  { %v1055_v9 = vpop.f32.mrf.mxu1  ;;  %1554 = vst [vmem:[#allocation10 + $0x1e8] sm:$0xff] %v971_v36  ;;  %1379 = vmatmul.f32.vlgmr.msrb.gmra.mxu2 %v2113_v3  ;;  %1444 = vmatmul.f32.vlgmr.msrb.gmra.mxu3 %v2116_v31 }
 0x1e9   :  { %v1056_v50 = vadd.f32 %v1055_v9, %v990_v8 }
 0x1ea   :  { %1249 = vmatmul.f32.vlgmr.msrb.gmra.mxu0 %v2119_v53 }
 0x1eb   :  { %1314 = vmatmul.f32.vlgmr.msrb.gmra.mxu1 %v2122_v30  ;;  %v1120_v17 = vpop.f32.mrf.mxu2  ;;  %v1185_v6 = vpop.f32.mrf.mxu3 }
 0x1ec   :  { %v1121_v56 = vadd.f32 %v1120_v17, %v1056_v50 }
 0x1ee   :  { %v1186_v37 = vadd.f32 %v1185_v6, %v1121_v56 }
 0x1ef   :  { %v993_v51 = vpop.f32.mrf.mxu0 }
 0x1f0   :  { %v1058_v49 = vpop.f32.mrf.mxu1  ;;  %1495 = vst [vmem:[#allocation10 + $0x10] sm:$0xff] %v1186_v37  ;;  %1382 = vmatmul.f32.gmra.mxu2 %v2125_v29  ;;  %1447 = vmatmul.f32.gmra.mxu3 %v2128_v46 }
 0x1f1   :  { %v1059_v19 = vadd.f32 %v1058_v49, %v993_v51 }
 0x1f2   :  { %1252 = vmatmul.f32.gmra.mxu0 %v2131_v41 }
 0x1f3   :  { %1317 = vmatmul.f32.gmra.mxu1 %v2134_v47  ;;  %v1123_v3 = vpop.f32.mrf.mxu2  ;;  %v1188_v31 = vpop.f32.mrf.mxu3 }
 0x1f4   :  { %v1124_v53 = vadd.f32 %v1123_v3, %v1059_v19 }
 0x1f6   :  { %v1189_v30 = vadd.f32 %v1188_v31, %v1124_v53 }
 0x1f7   :  { %v996_v9 = vpop.f32.mrf.mxu0 }
 0x1f8   :  { %v1061_v40 = vpop.f32.mrf.mxu1  ;;  %1499 = vst [vmem:[#allocation10 + $0x30] sm:$0xff] %v1189_v30  ;;  %1385 = vmatmul.f32.gmra.mxu2 %v2137_v54  ;;  %1450 = vmatmul.f32.gmra.mxu3 %v2140_v4 }
 0x1f9   :  { %v1062_v56 = vadd.f32 %v1061_v40, %v996_v9 }
 0x1fa   :  { %1255 = vmatmul.f32.gmra.mxu0 %v2143_v28 }
 0x1fb   :  { %1320 = vmatmul.f32.gmra.mxu1 %v2146_v26  ;;  %v1126_v29 = vpop.f32.mrf.mxu2  ;;  %v1191_v46 = vpop.f32.mrf.mxu3 }
 0x1fc   :  { %v1127_v41 = vadd.f32 %v1126_v29, %v1062_v56 }
 0x1fe   :  { %v1192_v47 = vadd.f32 %v1191_v46, %v1127_v41 }
 0x1ff   :  { %v999_v49 = vpop.f32.mrf.mxu0 }
 0x200   :  { %v1064_v6 = vpop.f32.mrf.mxu1  ;;  %1503 = vst [vmem:[#allocation10 + $0x50] sm:$0xff] %v1192_v47  ;;  %1388 = vmatmul.f32.gmra.mxu2 %v2149_v55  ;;  %1453 = vmatmul.f32.gmra.mxu3 %v2152_v10 }
 0x201   :  { %v1065_v37 = vadd.f32 %v1064_v6, %v999_v49 }
 0x202   :  { %1258 = vmatmul.f32.gmra.mxu0 %v2155_v11 }
 0x203   :  { %1323 = vmatmul.f32.gmra.mxu1 %v2158_v45  ;;  %v1129_v54 = vpop.f32.mrf.mxu2  ;;  %v1194_v4 = vpop.f32.mrf.mxu3 }
 0x204   :  { %v1130_v28 = vadd.f32 %v1129_v54, %v1065_v37 }
 0x206   :  { %v1195_v26 = vadd.f32 %v1194_v4, %v1130_v28 }
 0x207   :  { %v1002_v51 = vpop.f32.mrf.mxu0 }
 0x208   :  { %v1067_v21 = vpop.f32.mrf.mxu1  ;;  %1507 = vst [vmem:[#allocation10 + $0x70] sm:$0xff] %v1195_v26  ;;  %1391 = vmatmul.f32.gmra.mxu2 %v2161_v60  ;;  %1456 = vmatmul.f32.gmra.mxu3 %v2164_v61 }
 0x209   :  { %v1068_v59 = vadd.f32 %v1067_v21, %v1002_v51  ;;  %v2441_v21 = vld [vmem:[#allocation16_spill] sm:$0xff] }
 0x20a   :  { %1261 = vmatmul.f32.gmra.mxu0 %v2167_v38 }
 0x20b   :  { %1326 = vmatmul.f32.gmra.mxu1 %v2170_v14  ;;  %v1132_v55 = vpop.f32.mrf.mxu2  ;;  %v1197_v10 = vpop.f32.mrf.mxu3 }
 0x20c   :  { %v1133_v11 = vadd.f32 %v1132_v55, %v1068_v59 }
 0x20e   :  { %v1198_v45 = vadd.f32 %v1197_v10, %v1133_v11  ;;  %v2442_v11 = vld [vmem:[#allocation17_spill] sm:$0xff] }
 0x20f   :  { %v1005_v36 = vpop.f32.mrf.mxu0 }
 0x210   :  { %v1070_v8 = vpop.f32.mrf.mxu1  ;;  %1511 = vst [vmem:[#allocation10 + $0x90] sm:$0xff] %v1198_v45  ;;  %1394 = vmatmul.f32.gmra.mxu2 %v2173_v15  ;;  %1459 = vmatmul.f32.gmra.mxu3 %v2176_v5 }
 0x211   :  { %v1071_v50 = vadd.f32 %v1070_v8, %v1005_v36  ;;  %v2443_v36 = vld [vmem:[#allocation18_spill] sm:$0xff]  ;;  %v2445_v8 = vld [vmem:[#allocation20_spill] sm:$0xff] }
 0x212   :  { %1264 = vmatmul.f32.gmra.mxu0 %v2179_v43 }
 0x213   :  { %1329 = vmatmul.f32.gmra.mxu1 %v2182_v22  ;;  %v1135_v60 = vpop.f32.mrf.mxu2  ;;  %v1200_v61 = vpop.f32.mrf.mxu3 }
 0x214   :  { %v1136_v38 = vadd.f32 %v1135_v60, %v1071_v50 }
 0x216   :  { %v1201_v14 = vadd.f32 %v1200_v61, %v1136_v38 }
 0x217   :  { %v1008_v17 = vpop.f32.mrf.mxu0 }
 0x218   :  { %v1073_v19 = vpop.f32.mrf.mxu1  ;;  %1515 = vst [vmem:[#allocation10 + $0xb0] sm:$0xff] %v1201_v14  ;;  %1397 = vmatmul.f32.gmra.mxu2 %v2185_v32  ;;  %1462 = vmatmul.f32.gmra.mxu3 %v2188_v33 }
 0x219   :  { %v1074_v3 = vadd.f32 %v1073_v19, %v1008_v17  ;;  %v2446_v17 = vld [vmem:[#allocation21_spill] sm:$0xff] }
 0x21a   :  { %1267 = vmatmul.f32.gmra.mxu0 %v2191_v39 }
 0x21b   :  { %1332 = vmatmul.f32.gmra.mxu1 %v2194_v58  ;;  %v1138_v15 = vpop.f32.mrf.mxu2  ;;  %v1203_v5 = vpop.f32.mrf.mxu3 }
 0x21c   :  { %v1139_v43 = vadd.f32 %v1138_v15, %v1074_v3  ;;  %v2447_v3 = vld [vmem:[#allocation22_spill] sm:$0xff]  ;;  %v2448_v15 = vld [vmem:[#allocation23_spill] sm:$0xff] }
 0x21e   :  { %v1204_v22 = vadd.f32 %v1203_v5, %v1139_v43  ;;  %v2449_v5 = vld [vmem:[#allocation24_spill] sm:$0xff] }
 0x21f   :  { %v1011_v31 = vpop.f32.mrf.mxu0 }
 0x220   :  { %v1076_v53 = vpop.f32.mrf.mxu1  ;;  %1519 = vst [vmem:[#allocation10 + $0xd0] sm:$0xff] %v1204_v22  ;;  %1400 = vmatmul.f32.gmra.mxu2 %v2197_v35  ;;  %1465 = vmatmul.f32.gmra.mxu3 %v2200_v2 }
 0x221   :  { %v1077_v30 = vadd.f32 %v1076_v53, %v1011_v31 }
 0x222   :  { %1270 = vmatmul.f32.gmra.mxu0 %v2203_v63 }
 0x223   :  { %1335 = vmatmul.f32.gmra.mxu1 %v2206_v16  ;;  %v1141_v32 = vpop.f32.mrf.mxu2  ;;  %v1206_v33 = vpop.f32.mrf.mxu3 }
 0x224   :  { %v1142_v39 = vadd.f32 %v1141_v32, %v1077_v30 }
 0x226   :  { %v1207_v58 = vadd.f32 %v1206_v33, %v1142_v39  ;;  %v2450_v33 = vld [vmem:[#allocation25_spill] sm:$0xff] }
 0x227   :  { %v1014_v9 = vpop.f32.mrf.mxu0 }
 0x228   :  { %v1079_v40 = vpop.f32.mrf.mxu1  ;;  %1523 = vst [vmem:[#allocation10 + $0xf0] sm:$0xff] %v1207_v58  ;;  %1403 = vmatmul.f32.gmra.mxu2 %v2209_v42  ;;  %1468 = vmatmul.f32.gmra.mxu3 %v2212_v20  ;;  %v2451_v58 = vld [vmem:[#allocation26_spill] sm:$0xff] }
 0x229   :  { %v1080_v56 = vadd.f32 %v1079_v40, %v1014_v9  ;;  %v2452_v9 = vld [vmem:[#allocation27_spill] sm:$0xff]  ;;  %v2453_v40 = vld [vmem:[#allocation28_spill] sm:$0xff] }
 0x22a   :  { %1273 = vmatmul.f32.gmra.mxu0 %v2215_v25 }
 0x22b   :  { %1338 = vmatmul.f32.gmra.mxu1 %v2218_v27  ;;  %v1144_v35 = vpop.f32.mrf.mxu2  ;;  %v1209_v2 = vpop.f32.mrf.mxu3 }
 0x22c   :  { %v1145_v63 = vadd.f32 %v1144_v35, %v1080_v56 }
 0x22e   :  { %v1210_v16 = vadd.f32 %v1209_v2, %v1145_v63 }
 0x22f   :  { %v1017_v29 = vpop.f32.mrf.mxu0 }
 0x230   :  { %v1082_v46 = vpop.f32.mrf.mxu1  ;;  %1527 = vst [vmem:[#allocation10 + $0x110] sm:$0xff] %v1210_v16  ;;  %1406 = vmatmul.f32.gmra.mxu2 %v2221_v44  ;;  %1471 = vmatmul.f32.gmra.mxu3 %v2224_v34 }
 0x231   :  { %v1083_v41 = vadd.f32 %v1082_v46, %v1017_v29 }
 0x232   :  { %1276 = vmatmul.f32.gmra.mxu0 %v2227_v0 }
 0x233   :  { %1341 = vmatmul.f32.gmra.mxu1 %v2230_v1  ;;  %v1147_v42 = vpop.f32.mrf.mxu2  ;;  %v1212_v20 = vpop.f32.mrf.mxu3 }
 0x234   :  { %v1148_v25 = vadd.f32 %v1147_v42, %v1083_v41 }
 0x236   :  { %v1213_v27 = vadd.f32 %v1212_v20, %v1148_v25 }
 0x237   :  { %v1020_v47 = vpop.f32.mrf.mxu0 }
 0x238   :  { %v1085_v49 = vpop.f32.mrf.mxu1  ;;  %1531 = vst [vmem:[#allocation10 + $0x130] sm:$0xff] %v1213_v27  ;;  %1409 = vmatmul.f32.gmra.mxu2 %v2233_v13  ;;  %1474 = vmatmul.f32.gmra.mxu3 %v2236_v48 }
 0x239   :  { %v1086_v6 = vadd.f32 %v1085_v49, %v1020_v47 }
 0x23a   :  { %1279 = vmatmul.f32.gmra.mxu0 %v2239_v23 }
 0x23b   :  { %1344 = vmatmul.f32.gmra.mxu1 %v2242_v24  ;;  %v1150_v44 = vpop.f32.mrf.mxu2  ;;  %v1215_v34 = vpop.f32.mrf.mxu3 }
 0x23c   :  { %v1151_v0 = vadd.f32 %v1150_v44, %v1086_v6 }
 0x23e   :  { %v1216_v1 = vadd.f32 %v1215_v34, %v1151_v0 }
 0x23f   :  { %v1023_v37 = vpop.f32.mrf.mxu0 }
 0x240   :  { %v1088_v54 = vpop.f32.mrf.mxu1  ;;  %1535 = vst [vmem:[#allocation10 + $0x150] sm:$0xff] %v1216_v1  ;;  %1412 = vmatmul.f32.gmra.mxu2 %v2245_v12  ;;  %1477 = vmatmul.f32.gmra.mxu3 %v2248_v62  ;;  %v2440_v12 = vld [vmem:[#allocation15_spill] sm:$0xff] }
 0x241   :  { %v1089_v4 = vadd.f32 %v1088_v54, %v1023_v37 }
 0x242   :  { %1282 = vmatmul.f32.gmra.mxu0 %v2251_v18 }
 0x243   :  { %1347 = vmatmul.f32.gmra.mxu1 %v2254_v52  ;;  %v1153_v13 = vpop.f32.mrf.mxu2  ;;  %v1218_v48 = vpop.f32.mrf.mxu3 }
 0x244   :  { %v1154_v23 = vadd.f32 %v1153_v13, %v1089_v4 }
 0x246   :  { %v1219_v24 = vadd.f32 %v1218_v48, %v1154_v23 }
 0x247   :  { %v1026_v28 = vpop.f32.mrf.mxu0 }
 0x248   :  { %v1091_v26 = vpop.f32.mrf.mxu1  ;;  %1539 = vst [vmem:[#allocation10 + $0x170] sm:$0xff] %v1219_v24  ;;  %1415 = vmatmul.f32.gmra.mxu2 %v2257_v57  ;;  %1480 = vmatmul.f32.gmra.mxu3 %v2260_v7  ;;  %v2444_v57 = vld [vmem:[#allocation19_spill] sm:$0xff] }
 0x249   :  { %v1092_v51 = vadd.f32 %v1091_v26, %v1026_v28 }
 0x24a   :  { %1285 = vmatmul.f32.gmra.mxu0 %v2440_v12 }
 0x24b   :  { %1350 = vmatmul.f32.gmra.mxu1 %v2441_v21  ;;  %v1156_v62 = vpop.f32.mrf.mxu2  ;;  %v1221_v18 = vpop.f32.mrf.mxu3 }
 0x24c   :  { %v1157_v59 = vadd.f32 %v1156_v62, %v1092_v51 }
 0x24e   :  { %v1222_v52 = vadd.f32 %v1221_v18, %v1157_v59 }
 0x24f   :  { %v1029_v55 = vpop.f32.mrf.mxu0 }
 0x250   :  { %v1094_v10 = vpop.f32.mrf.mxu1  ;;  %1543 = vst [vmem:[#allocation10 + $0x190] sm:$0xff] %v1222_v52  ;;  %1418 = vmatmul.f32.gmra.mxu2 %v2442_v11  ;;  %1483 = vmatmul.f32.gmra.mxu3 %v2443_v36 }
 0x251   :  { %v1095_v45 = vadd.f32 %v1094_v10, %v1029_v55 }
 0x252   :  { %1288 = vmatmul.f32.gmra.mxu0 %v2444_v57 }
 0x253   :  { %1353 = vmatmul.f32.gmra.mxu1 %v2445_v8  ;;  %v1159_v7 = vpop.f32.mrf.mxu2  ;;  %v1224_v50 = vpop.f32.mrf.mxu3 }
 0x254   :  { %v1160_v60 = vadd.f32 %v1159_v7, %v1095_v45 }
 0x256   :  { %v1225_v61 = vadd.f32 %v1224_v50, %v1160_v60 }
 0x257   :  { %v1032_v38 = vpop.f32.mrf.mxu0 }
 0x258   :  { %v1097_v14 = vpop.f32.mrf.mxu1  ;;  %1547 = vst [vmem:[#allocation10 + $0x1b0] sm:$0xff] %v1225_v61  ;;  %1421 = vmatmul.f32.gmra.mxu2 %v2446_v17  ;;  %1486 = vmatmul.f32.gmra.mxu3 %v2447_v3 }
 0x259   :  { %v1098_v19 = vadd.f32 %v1097_v14, %v1032_v38 }
 0x25a   :  { %1291 = vmatmul.f32.gmra.mxu0 %v2448_v15 }
 0x25b   :  { %1356 = vmatmul.f32.gmra.mxu1 %v2449_v5  ;;  %v1162_v43 = vpop.f32.mrf.mxu2  ;;  %v1227_v22 = vpop.f32.mrf.mxu3 }
 0x25c   :  { %v1163_v31 = vadd.f32 %v1162_v43, %v1098_v19 }
 0x25e   :  { %v1228_v53 = vadd.f32 %v1227_v22, %v1163_v31 }
 0x25f   :  { %v1035_v30 = vpop.f32.mrf.mxu0 }
 0x260   :  { %v1100_v32 = vpop.f32.mrf.mxu1  ;;  %1551 = vst [vmem:[#allocation10 + $0x1d0] sm:$0xff] %v1228_v53  ;;  %1424 = vmatmul.f32.gmra.mxu2 %v2450_v33  ;;  %1489 = vmatmul.f32.gmra.mxu3 %v2451_v58 }
 0x261   :  { %v1101_v39 = vadd.f32 %v1100_v32, %v1035_v30 }
 0x262   :  { %1294 = vmatmul.f32.gmra.mxu0 %v2452_v9 }
 0x263   :  { %1359 = vmatmul.f32.gmra.mxu1 %v2453_v40  ;;  %v1165_v56 = vpop.f32.mrf.mxu2  ;;  %v1230_v35 = vpop.f32.mrf.mxu3 }
 0x264   :  { %v1166_v2 = vadd.f32 %v1165_v56, %v1101_v39 }
 0x266   :  { %v1231_v63 = vadd.f32 %v1230_v35, %v1166_v2 }
 0x267   :  { %v1250_v16 = vpop.f32.mrf.mxu0 }
 0x268   :  { %v1315_v29 = vpop.f32.mrf.mxu1  ;;  %1555 = vst [vmem:[#allocation10 + $0x1f0] sm:$0xff] %v1231_v63 }
 0x269   :  { %v1316_v46 = vadd.f32 %v1315_v29, %v1250_v16 }
 0x26b   :  { %v1380_v41 = vpop.f32.mrf.mxu2  ;;  %v1445_v42 = vpop.f32.mrf.mxu3 }
 0x26c   :  { %v1381_v20 = vadd.f32 %v1380_v41, %v1316_v46 }
 0x26e   :  { %v1446_v25 = vadd.f32 %v1445_v42, %v1381_v20 }
 0x26f   :  { %v1253_v27 = vpop.f32.mrf.mxu0 }
 0x270   :  { %v1318_v47 = vpop.f32.mrf.mxu1  ;;  %1496 = vst [vmem:[#allocation10 + $0x18] sm:$0xff] %v1446_v25 }
 0x271   :  { %v1319_v49 = vadd.f32 %v1318_v47, %v1253_v27 }
 0x273   :  { %v1383_v6 = vpop.f32.mrf.mxu2  ;;  %v1448_v44 = vpop.f32.mrf.mxu3 }
 0x274   :  { %v1384_v34 = vadd.f32 %v1383_v6, %v1319_v49 }
 0x276   :  { %v1449_v0 = vadd.f32 %v1448_v44, %v1384_v34 }
 0x277   :  { %v1256_v1 = vpop.f32.mrf.mxu0 }
 0x278   :  { %v1321_v37 = vpop.f32.mrf.mxu1  ;;  %1500 = vst [vmem:[#allocation10 + $0x38] sm:$0xff] %v1449_v0 }
 0x279   :  { %v1322_v54 = vadd.f32 %v1321_v37, %v1256_v1 }
 0x27b   :  { %v1386_v4 = vpop.f32.mrf.mxu2  ;;  %v1451_v13 = vpop.f32.mrf.mxu3 }
 0x27c   :  { %v1387_v48 = vadd.f32 %v1386_v4, %v1322_v54 }
 0x27e   :  { %v1452_v23 = vadd.f32 %v1451_v13, %v1387_v48 }
 0x27f   :  { %v1259_v24 = vpop.f32.mrf.mxu0 }
 0x280   :  { %v1324_v28 = vpop.f32.mrf.mxu1  ;;  %1504 = vst [vmem:[#allocation10 + $0x58] sm:$0xff] %v1452_v23 }
 0x281   :  { %v1325_v26 = vadd.f32 %v1324_v28, %v1259_v24 }
 0x283   :  { %v1389_v51 = vpop.f32.mrf.mxu2  ;;  %v1454_v12 = vpop.f32.mrf.mxu3 }
 0x284   :  { %v1390_v21 = vadd.f32 %v1389_v51, %v1325_v26 }
 0x286   :  { %v1455_v62 = vadd.f32 %v1454_v12, %v1390_v21 }
 0x287   :  { %v1262_v18 = vpop.f32.mrf.mxu0 }
 0x288   :  { %v1327_v59 = vpop.f32.mrf.mxu1  ;;  %1508 = vst [vmem:[#allocation10 + $0x78] sm:$0xff] %v1455_v62 }
 0x289   :  { %v1328_v52 = vadd.f32 %v1327_v59, %v1262_v18 }
 0x28b   :  { %v1392_v55 = vpop.f32.mrf.mxu2  ;;  %v1457_v10 = vpop.f32.mrf.mxu3 }
 0x28c   :  { %v1393_v11 = vadd.f32 %v1392_v55, %v1328_v52 }
 0x28e   :  { %v1458_v45 = vadd.f32 %v1457_v10, %v1393_v11 }
 0x28f   :  { %v1265_v36 = vpop.f32.mrf.mxu0 }
 0x290   :  { %v1330_v57 = vpop.f32.mrf.mxu1  ;;  %1512 = vst [vmem:[#allocation10 + $0x98] sm:$0xff] %v1458_v45 }
 0x291   :  { %v1331_v8 = vadd.f32 %v1330_v57, %v1265_v36 }
 0x293   :  { %v1395_v7 = vpop.f32.mrf.mxu2  ;;  %v1460_v50 = vpop.f32.mrf.mxu3 }
 0x294   :  { %v1396_v60 = vadd.f32 %v1395_v7, %v1331_v8 }
 0x296   :  { %v1461_v61 = vadd.f32 %v1460_v50, %v1396_v60 }
 0x297   :  { %v1268_v38 = vpop.f32.mrf.mxu0 }
 0x298   :  { %v1333_v14 = vpop.f32.mrf.mxu1  ;;  %1516 = vst [vmem:[#allocation10 + $0xb8] sm:$0xff] %v1461_v61 }
 0x299   :  { %v1334_v17 = vadd.f32 %v1333_v14, %v1268_v38 }
 0x29b   :  { %v1398_v19 = vpop.f32.mrf.mxu2  ;;  %v1463_v3 = vpop.f32.mrf.mxu3 }
 0x29c   :  { %v1399_v15 = vadd.f32 %v1398_v19, %v1334_v17 }
 0x29e   :  { %v1464_v5 = vadd.f32 %v1463_v3, %v1399_v15 }
 0x29f   :  { %v1271_v43 = vpop.f32.mrf.mxu0 }
 0x2a0   :  { %v1336_v22 = vpop.f32.mrf.mxu1  ;;  %1520 = vst [vmem:[#allocation10 + $0xd8] sm:$0xff] %v1464_v5 }
 0x2a1   :  { %v1337_v31 = vadd.f32 %v1336_v22, %v1271_v43 }
 0x2a3   :  { %v1401_v53 = vpop.f32.mrf.mxu2  ;;  %v1466_v30 = vpop.f32.mrf.mxu3 }
 0x2a4   :  { %v1402_v32 = vadd.f32 %v1401_v53, %v1337_v31 }
 0x2a6   :  { %v1467_v33 = vadd.f32 %v1466_v30, %v1402_v32 }
 0x2a7   :  { %v1274_v39 = vpop.f32.mrf.mxu0 }
 0x2a8   :  { %v1339_v58 = vpop.f32.mrf.mxu1  ;;  %1524 = vst [vmem:[#allocation10 + $0xf8] sm:$0xff] %v1467_v33 }
 0x2a9   :  { %v1340_v9 = vadd.f32 %v1339_v58, %v1274_v39 }
 0x2ab   :  { %v1404_v40 = vpop.f32.mrf.mxu2  ;;  %v1469_v56 = vpop.f32.mrf.mxu3 }
 0x2ac   :  { %v1405_v35 = vadd.f32 %v1404_v40, %v1340_v9 }
 0x2ae   :  { %v1470_v2 = vadd.f32 %v1469_v56, %v1405_v35 }
 0x2af   :  { %v1277_v63 = vpop.f32.mrf.mxu0 }
 0x2b0   :  { %v1342_v16 = vpop.f32.mrf.mxu1  ;;  %1528 = vst [vmem:[#allocation10 + $0x118] sm:$0xff] %v1470_v2 }
 0x2b1   :  { %v1343_v29 = vadd.f32 %v1342_v16, %v1277_v63 }
 0x2b3   :  { %v1407_v46 = vpop.f32.mrf.mxu2  ;;  %v1472_v41 = vpop.f32.mrf.mxu3 }
 0x2b4   :  { %v1408_v42 = vadd.f32 %v1407_v46, %v1343_v29 }
 0x2b6   :  { %v1473_v20 = vadd.f32 %v1472_v41, %v1408_v42 }
 0x2b7   :  { %v1280_v25 = vpop.f32.mrf.mxu0 }
 0x2b8   :  { %v1345_v27 = vpop.f32.mrf.mxu1  ;;  %1532 = vst [vmem:[#allocation10 + $0x138] sm:$0xff] %v1473_v20 }
 0x2b9   :  { %v1346_v47 = vadd.f32 %v1345_v27, %v1280_v25 }
 0x2bb   :  { %v1410_v49 = vpop.f32.mrf.mxu2  ;;  %v1475_v6 = vpop.f32.mrf.mxu3 }
 0x2bc   :  { %v1411_v44 = vadd.f32 %v1410_v49, %v1346_v47 }
 0x2be   :  { %v1476_v34 = vadd.f32 %v1475_v6, %v1411_v44 }
 0x2bf   :  { %v1283_v0 = vpop.f32.mrf.mxu0 }
 0x2c0   :  { %v1348_v1 = vpop.f32.mrf.mxu1  ;;  %1536 = vst [vmem:[#allocation10 + $0x158] sm:$0xff] %v1476_v34 }
 0x2c1   :  { %v1349_v37 = vadd.f32 %v1348_v1, %v1283_v0 }
 0x2c3   :  { %v1413_v54 = vpop.f32.mrf.mxu2  ;;  %v1478_v4 = vpop.f32.mrf.mxu3 }
 0x2c4   :  { %v1414_v13 = vadd.f32 %v1413_v54, %v1349_v37 }
 0x2c6   :  { %v1479_v48 = vadd.f32 %v1478_v4, %v1414_v13 }
 0x2c7   :  { %v1286_v23 = vpop.f32.mrf.mxu0 }
 0x2c8   :  { %v1351_v24 = vpop.f32.mrf.mxu1  ;;  %1540 = vst [vmem:[#allocation10 + $0x178] sm:$0xff] %v1479_v48 }
 0x2c9   :  { %v1352_v28 = vadd.f32 %v1351_v24, %v1286_v23 }
 0x2cb   :  { %v1416_v26 = vpop.f32.mrf.mxu2  ;;  %v1481_v51 = vpop.f32.mrf.mxu3 }
 0x2cc   :  { %v1417_v12 = vadd.f32 %v1416_v26, %v1352_v28 }
 0x2ce   :  { %v1482_v21 = vadd.f32 %v1481_v51, %v1417_v12 }
 0x2cf   :  { %v1289_v62 = vpop.f32.mrf.mxu0 }
 0x2d0   :  { %v1354_v18 = vpop.f32.mrf.mxu1  ;;  %1544 = vst [vmem:[#allocation10 + $0x198] sm:$0xff] %v1482_v21 }
 0x2d1   :  { %v1355_v59 = vadd.f32 %v1354_v18, %v1289_v62 }
 0x2d3   :  { %v1419_v52 = vpop.f32.mrf.mxu2  ;;  %v1484_v55 = vpop.f32.mrf.mxu3 }
 0x2d4   :  { %v1420_v10 = vadd.f32 %v1419_v52, %v1355_v59 }
 0x2d6   :  { %v1485_v11 = vadd.f32 %v1484_v55, %v1420_v10 }
 0x2d7   :  { %v1292_v45 = vpop.f32.mrf.mxu0 }
 0x2d8   :  { %v1357_v36 = vpop.f32.mrf.mxu1  ;;  %1548 = vst [vmem:[#allocation10 + $0x1b8] sm:$0xff] %v1485_v11 }
 0x2d9   :  { %v1358_v57 = vadd.f32 %v1357_v36, %v1292_v45 }
 0x2db   :  { %v1422_v8 = vpop.f32.mrf.mxu2  ;;  %v1487_v7 = vpop.f32.mrf.mxu3 }
 0x2dc   :  { %v1423_v50 = vadd.f32 %v1422_v8, %v1358_v57 }
 0x2de   :  { %v1488_v60 = vadd.f32 %v1487_v7, %v1423_v50 }
 0x2df   :  { %v1295_v61 = vpop.f32.mrf.mxu0 }
 0x2e0   :  { %v1360_v38 = vpop.f32.mrf.mxu1  ;;  %1552 = vst [vmem:[#allocation10 + $0x1d8] sm:$0xff] %v1488_v60 }
 0x2e1   :  { %v1361_v14 = vadd.f32 %v1360_v38, %v1295_v61 }
 0x2e3   :  { %v1425_v17 = vpop.f32.mrf.mxu2  ;;  %v1490_v19 = vpop.f32.mrf.mxu3 }
 0x2e4   :  { %v1426_v3 = vadd.f32 %v1425_v17, %v1361_v14 }
 0x2e6   :  { %v1491_v15 = vadd.f32 %v1490_v19, %v1426_v3 }
 0x2e8   :  { %1556 = vst [vmem:[#allocation10 + $0x1f8] sm:$0xff] %v1491_v15 }
 0x2e9   :  { %1569 = dma.vmem_to_hbm [thread:$0]  %s1562_s10, 8192, %s1564_s13, [#allocation7], %s1801_s23, %s1801_s23, %s1802_s24  }
 0x2ea   :  { %1793 = dma.done.wait [#allocation7], 8192  }
 0x2eb   :  { %1794 = vsyncadd [#allocation7], 4294959104 }
 0x2ec   :  { %1574 = vsyncpa [#allocation6], 1 }
 0x2ed   :  { %1575 = vsyncpa [#allocation9], 1 }
 0x2ee   :  { %1576 = vsyncpa [#allocation7], 1 }

</bundles_post_ra>
